<compile_context>
chip_gen: v5e
topology: v5e:2x2
jax: 0.10.0
libtpu: 0.0.40
codegen_flags: <defaults>
</compile_context>

<pallas_src>
import jax
import jax.numpy as jnp
from jax.experimental import pallas as pl
from jax.experimental.pallas import tpu as pltpu

BETA = 0.5        # snn.Leaky beta (mem starts at 0, so mem_new = cur; beta is inert here)
THRESHOLD = 1.0   # snn.Leaky default threshold
K_IN = 3197       # true input feature count
K_PAD = 3200      # padded contraction dim (25 * 128); col K_IN of x holds the bias "1"


def snn_kernel(x_ref, w1_ref, w2_ref, w3_ref, b23_ref, out_ref):
    x = x_ref[...]                                                     # (B, 3200) bf16

    # Layer 1: Linear(3197,128) (bias folded into row 3197 of w1) in ONE lane-dense
    # matmul; max_pool1d(2) == max of even-pool lanes [:64] vs odd-pool lanes [64:].
    h1 = jnp.dot(x, w1_ref[...], preferred_element_type=jnp.float32)  # (B, 128) f32
    cur1 = jnp.maximum(h1[:, :64], h1[:, 64:])                        # (B, 64)
    # Leaky neuron, mem0 = 0: mem = beta*0 + cur1 ; spk = heaviside(mem - threshold)
    spk1 = (cur1 > THRESHOLD).astype(jnp.bfloat16)

    # Layer 2: Linear(64,64) + max_pool1d(2), same even/odd lane packing.
    h2 = (jnp.dot(spk1, w2_ref[...], preferred_element_type=jnp.float32)
          + b23_ref[0:1, :])                                          # (B, 64)
    cur2 = jnp.maximum(h2[:, :32], h2[:, 32:])                        # (B, 32)
    spk2 = (cur2 > THRESHOLD).astype(jnp.bfloat16)

    # Layer 3: Linear(32,2) + softmax(dim=1), written in 2-class sigmoid form
    # (avoids cross-lane max/exp/sum reductions on a 2-wide row).
    cur3 = (jnp.dot(spk2, w3_ref[...], preferred_element_type=jnp.float32)
            + b23_ref[1:2, 0:2])                                      # (B, 2)
    d = cur3[:, 1:2] - cur3[:, 0:1]                                   # (B, 1)
    p0 = pl.reciprocal(1.0 + jnp.exp(d), approx=True)                 # softmax[:, 0]
    out_ref[...] = jnp.concatenate([p0, 1.0 - p0], axis=1)            # rows sum to 1


def net_forward(x, params):
    """x: (B, 3197) float32. Returns softmax probabilities (B, 2) float32."""
    w1, w2, w3, b23 = params
    B = x.shape[0]

    # Host-side prep: zero-pad K 3197 -> 3200, set column 3197 to 1.0 (folds the
    # layer-1 bias into the matmul), cast to bf16 to halve the dominant DMA bytes.
    x_pad = jnp.zeros((B, K_PAD), jnp.float32)
    x_pad = x_pad.at[:, :K_IN].set(x)
    x_pad = x_pad.at[:, K_IN].set(1.0)
    x_pad = x_pad.astype(jnp.bfloat16)

    vmem = pl.BlockSpec(memory_space=pltpu.MemorySpace.VMEM)
    return pl.pallas_call(
        snn_kernel,
        out_shape=jax.ShapeDtypeStruct((B, 2), jnp.float32),
        in_specs=[vmem] * 5,
        out_specs=vmem,
    )(x_pad, w1, w2, w3, b23)


def init_params(key):
    """Deterministic init mimicking torch.nn.Linear (uniform +/- 1/sqrt(fan_in)).
    Weights are built as (in_features, out_features) so the kernel does y = x @ W."""
    def linear(key, fan_in, fan_out):
        kw, kb = jax.random.split(key)
        bound = 1.0 / jnp.sqrt(fan_in)
        w = jax.random.uniform(kw, (fan_in, fan_out), jnp.float32, -bound, bound)
        b = jax.random.uniform(kb, (fan_out,), jnp.float32, -bound, bound)
        return w, b

    k1, k2, k3 = jax.random.split(key, 3)
    w1, b1 = linear(k1, K_IN, 128)
    w2, b2 = linear(k2, 64, 64)
    w3, b3 = linear(k3, 32, 2)

    # Layer 1: lane-dense packing. Even-pool columns -> lanes [0:64], odd-pool
    # columns -> lanes [64:128]. Bias folded into row K_IN (paired with the x "1"
    # column); rows K_IN+1..K_PAD-1 are zero padding.
    w1p = jnp.zeros((K_PAD, 128), jnp.float32)
    w1p = w1p.at[:K_IN, :64].set(w1[:, 0::2])
    w1p = w1p.at[:K_IN, 64:].set(w1[:, 1::2])
    w1p = w1p.at[K_IN, :64].set(b1[0::2])
    w1p = w1p.at[K_IN, 64:].set(b1[1::2])
    w1p = w1p.astype(jnp.bfloat16)

    # Layer 2: same even/odd packing into a single (64, 64) matrix.
    w2p = jnp.concatenate([w2[:, 0::2], w2[:, 1::2]], axis=1).astype(jnp.bfloat16)

    w3p = w3.astype(jnp.bfloat16)

    # Remaining biases packed into ONE small f32 operand (row 0: pooled-layout b2,
    # row 1: b3 in lanes [0:2]) -> total pallas_call operand count is 5.
    b23 = jnp.zeros((2, 64), jnp.float32)
    b23 = b23.at[0, :32].set(b2[0::2])
    b23 = b23.at[0, 32:].set(b2[1::2])
    b23 = b23.at[1, :2].set(b3)

    return (w1p, w2p, w3p, b23)


if __name__ == "__main__":
    key = jax.random.PRNGKey(0)
    kx, kp = jax.random.split(key)

    B = 64  # module hardcodes batch_size = 64 in .view(batch_size, -1)
    x = jax.random.normal(kx, (B, K_IN), dtype=jnp.float32)
    params = init_params(kp)

    out = net_forward(x, params)
    out = jax.block_until_ready(out)

    assert out.shape == (B, 2)
    assert bool(jnp.all(jnp.isfinite(out)))
    # softmax rows should sum to ~1 (exact by construction up to f32 rounding)
    assert bool(jnp.allclose(jnp.sum(out, axis=-1), 1.0, atol=1e-5))
    assert bool(jnp.all(out >= 0.0)) and bool(jnp.all(out <= 1.0))
    print("KERNEL_OK")
</pallas_src>

<mosaic_0001>
module attributes {stable_mosaic.version = 11 : i64} {
  func.func @snn_kernel(%arg0: memref<64x3200xbf16, #tpu.memory_space<vmem>>, %arg1: memref<3200x128xbf16, #tpu.memory_space<vmem>>, %arg2: memref<64x64xbf16, #tpu.memory_space<vmem>>, %arg3: memref<32x2xbf16, #tpu.memory_space<vmem>>, %arg4: memref<2x64xf32, #tpu.memory_space<vmem>>, %arg5: memref<64x2xf32, #tpu.memory_space<vmem>>) attributes {dimension_semantics = [], scalar_prefetch = 0 : i64, scratch_operands = 0 : i64, tpu.core_type = #tpu.core_type<tc>} {
    %c0 = arith.constant 0 : index
    %c0_0 = arith.constant 0 : index
    %0 = vector.load %arg0[%c0, %c0_0] : memref<64x3200xbf16, #tpu.memory_space<vmem>>, vector<64x3200xbf16>
    %c0_1 = arith.constant 0 : index
    %c0_2 = arith.constant 0 : index
    %1 = vector.load %arg1[%c0_1, %c0_2] : memref<3200x128xbf16, #tpu.memory_space<vmem>>, vector<3200x128xbf16>
    %cst = arith.constant dense<0.000000e+00> : vector<64x128xf32>
    %2 = tpu.matmul %0, %1, %cst {dimension_numbers = #tpu.dot_dimension_numbers<[1], [0], [0], [1], [0, 0, 1, 1], [], []>} : vector<64x3200xbf16>, vector<3200x128xbf16>, vector<64x128xf32> -> vector<64x128xf32>
    %3 = vector.extract_strided_slice %2 {offsets = [0, 0], sizes = [64, 64], strides = [1, 1]} : vector<64x128xf32> to vector<64x64xf32>
    %4 = vector.extract_strided_slice %2 {offsets = [0, 64], sizes = [64, 64], strides = [1, 1]} : vector<64x128xf32> to vector<64x64xf32>
    %5 = arith.maximumf %3, %4 : vector<64x64xf32>
    %cst_3 = arith.constant 1.000000e+00 : f32
    %6 = vector.broadcast %cst_3 : f32 to vector<64x64xf32>
    %7 = arith.cmpf ogt, %5, %6 : vector<64x64xf32>
    %8 = arith.extui %7 : vector<64x64xi1> to vector<64x64xi32>
    %9 = arith.sitofp %8 : vector<64x64xi32> to vector<64x64xf32>
    %10 = arith.truncf %9 : vector<64x64xf32> to vector<64x64xbf16>
    %c0_4 = arith.constant 0 : index
    %c0_5 = arith.constant 0 : index
    %11 = vector.load %arg2[%c0_4, %c0_5] : memref<64x64xbf16, #tpu.memory_space<vmem>>, vector<64x64xbf16>
    %cst_6 = arith.constant dense<0.000000e+00> : vector<64x64xf32>
    %12 = tpu.matmul %10, %11, %cst_6 {dimension_numbers = #tpu.dot_dimension_numbers<[1], [0], [0], [1], [0, 0, 1, 1], [], []>} : vector<64x64xbf16>, vector<64x64xbf16>, vector<64x64xf32> -> vector<64x64xf32>
    %c0_7 = arith.constant 0 : index
    %c0_8 = arith.constant 0 : index
    %13 = vector.load %arg4[%c0_7, %c0_8] : memref<2x64xf32, #tpu.memory_space<vmem>>, vector<1x64xf32>
    %14 = vector.broadcast %13 : vector<1x64xf32> to vector<64x64xf32>
    %15 = arith.addf %12, %14 : vector<64x64xf32>
    %16 = vector.extract_strided_slice %15 {offsets = [0, 0], sizes = [64, 32], strides = [1, 1]} : vector<64x64xf32> to vector<64x32xf32>
    %17 = vector.extract_strided_slice %15 {offsets = [0, 32], sizes = [64, 32], strides = [1, 1]} : vector<64x64xf32> to vector<64x32xf32>
    %18 = arith.maximumf %16, %17 : vector<64x32xf32>
    %cst_9 = arith.constant 1.000000e+00 : f32
    %19 = vector.broadcast %cst_9 : f32 to vector<64x32xf32>
    %20 = arith.cmpf ogt, %18, %19 : vector<64x32xf32>
    %21 = arith.extui %20 : vector<64x32xi1> to vector<64x32xi32>
    %22 = arith.sitofp %21 : vector<64x32xi32> to vector<64x32xf32>
    %23 = arith.truncf %22 : vector<64x32xf32> to vector<64x32xbf16>
    %c0_10 = arith.constant 0 : index
    %c0_11 = arith.constant 0 : index
    %24 = vector.load %arg3[%c0_10, %c0_11] : memref<32x2xbf16, #tpu.memory_space<vmem>>, vector<32x2xbf16>
    %cst_12 = arith.constant dense<0.000000e+00> : vector<64x2xf32>
    %25 = tpu.matmul %23, %24, %cst_12 {dimension_numbers = #tpu.dot_dimension_numbers<[1], [0], [0], [1], [0, 0, 1, 1], [], []>} : vector<64x32xbf16>, vector<32x2xbf16>, vector<64x2xf32> -> vector<64x2xf32>
    %c1 = arith.constant 1 : index
    %c0_13 = arith.constant 0 : index
    %26 = vector.load %arg4[%c1, %c0_13] : memref<2x64xf32, #tpu.memory_space<vmem>>, vector<1x2xf32>
    %27 = vector.broadcast %26 : vector<1x2xf32> to vector<64x2xf32>
    %28 = arith.addf %25, %27 : vector<64x2xf32>
    %29 = vector.extract_strided_slice %28 {offsets = [0, 1], sizes = [64, 1], strides = [1, 1]} : vector<64x2xf32> to vector<64x1xf32>
    %30 = vector.extract_strided_slice %28 {offsets = [0, 0], sizes = [64, 1], strides = [1, 1]} : vector<64x2xf32> to vector<64x1xf32>
    %31 = arith.subf %29, %30 : vector<64x1xf32>
    %32 = math.exp %31 : vector<64x1xf32>
    %cst_14 = arith.constant 1.000000e+00 : f32
    %33 = vector.broadcast %cst_14 : f32 to vector<64x1xf32>
    %34 = arith.addf %33, %32 : vector<64x1xf32>
    %35 = tpu.reciprocal %34 {approx = true} : vector<64x1xf32> -> vector<64x1xf32>
    %cst_15 = arith.constant 1.000000e+00 : f32
    %36 = vector.broadcast %cst_15 : f32 to vector<64x1xf32>
    %37 = arith.subf %36, %35 : vector<64x1xf32>
    %38 = tpu.concatenate %35, %37 in 1 : vector<64x1xf32>, vector<64x1xf32> -> vector<64x2xf32>
    %c0_16 = arith.constant 0 : index
    %c0_17 = arith.constant 0 : index
    %39 = vector.load %arg5[%c0_16, %c0_17] : memref<64x2xf32, #tpu.memory_space<vmem>>, vector<64x2xf32>
    tpu.vector_store %arg5[%c0_16, %c0_17], %38 {strides = array<i32>} : memref<64x2xf32, #tpu.memory_space<vmem>>, vector<64x2xf32>,
    return
  }
}

</mosaic_0001>

<bundles_post_ra>
// kernel: tpu_custom_call.1
= control target key start
LH: loop header
LB: loop body
LE: loop exit
PB: predicated region body
PF: predicated region fallthrough
CT: control target
= control target key end

     0   :  { %10 = vsyncpa [#allocation3], 0  ;;  %s5491_s0 = inlined_call_operand.hbm [shape: bf16[64,3200], index: 0, kind: input, shape index: {}]   ;;  %s5492_s1 = inlined_call_operand.hbm [shape: bf16[3200,128], index: 1, kind: input, shape index: {}]   ;;  %s5493_s2 = inlined_call_operand.hbm [shape: bf16[64,64], index: 2, kind: input, shape index: {}]   ;;  %s5494_s3 = inlined_call_operand.vmem [shape: bf16[32,2], index: 3, kind: input, shape index: {}]   ;;  %s5495_s4 = inlined_call_operand.vmem [shape: f32[2,64], index: 4, kind: input, shape index: {}]   ;;  %s5496_s5 = inlined_call_operand.vmem [shape: f32[64,2], index: 5, kind: output, shape index: {}]  }
   0x1   :  { %11 = vsyncpa [#allocation5], 0  ;;  %s29_s20 = sshll.u32 %s5492_s1, 4  ;;  %s5098_s21 = smov [#allocation4]   ;;  %s30_s20 = int_to_ptr.hbm [resolvable:$true] %s29_s20 }
   0x2   :  { %s31_s22 = sshll.u32 %s5098_s21, 4  ;;  %s16_s25 = sshll.u32 %s5491_s0, 4  ;;  %s32_s22 = int_to_ptr.vmem [resolvable:$true] %s31_s22  ;;  %s17_s25 = int_to_ptr.hbm [resolvable:$true] %s16_s25 }
   0x3   :  { %s5099_s26 = smov 64   ;;  %s5100_s27 = smov 4  }
   0x4   :  { %37 = dma.hbm_to_vmem [thread:$0]  %s30_s20, 25600, %s32_s22, [#allocation5], %s5099_s26, %s5099_s26, %s5100_s27  }
   0x5   :  { %s5101_s28 = smov [#allocation2]   ;;  %s5102_s30 = smov 1600  }
   0x6   :  { %s18_s29 = sshll.u32 %s5101_s28, 4  ;;  %s5103_s6 = smov 100   ;;  %s19_s29 = int_to_ptr.vmem [resolvable:$true] %s18_s29 }
   0x7   :  { %24 = dma.hbm_to_vmem [thread:$0]  %s17_s25, 12800, %s19_s29, [#allocation3], %s5102_s30, %s5102_s30, %s5103_s6  }
   0x8   :  { %s42_s8 = sshll.u32 %s5493_s2, 4  ;;  %s5104_s9 = smov [#allocation6]   ;;  %s43_s8 = int_to_ptr.hbm [resolvable:$true] %s42_s8 }
   0x9   :  { %s44_s10 = sshll.u32 %s5104_s9, 4  ;;  %s45_s10 = int_to_ptr.vmem [resolvable:$true] %s44_s10 }
   0xa   :  { %50 = dma.hbm_to_vmem [thread:$0]  %s43_s8, 512, %s45_s10, [#allocation5], %s5099_s26, %s5099_s26, %s5100_s27  }
   0xb   :  { %5094 = dma.done.wait [#allocation3], 12800  }
   0xc   :  { %5095 = vsyncadd [#allocation3], 4294954496 }
   0xd   :  { %5096 = dma.done.wait [#allocation5], 26112  }
   0xe   :  { %5097 = vsyncadd [#allocation5], 4294941184  ;;  %v4764_v0 = vld [vmem:[#allocation4 + $0x38] sm:$0xff]  ;;  %v4763_v3 = vld [vmem:[#allocation4 + $0x30] sm:$0xff]  ;;  %vm3103_vm2 = vcmask 523264   ;;  %s5106_s11 = smov 96  }
   0xf   :  { %v4772_v1 = vld [vmem:[#allocation4 + $0x78] sm:$0xff]  ;;  %2276 = vmatpush.bf16.msra.mxu0 %v4764_v0  ;;  %4963 = vmatpush.bf16.msra.mxu3 %v4764_v0  ;;  %v4771_v4 = vld [vmem:[#allocation4 + $0x70] sm:$0xff]  ;;  %v4762_v6 = vld [vmem:[#allocation4 + $0x28] sm:$0xff]  ;;  %vm3231_vm11 = vcmask 261120   ;;  %s5107_s17 = smov 1  }
  0x10   :  { %v4780_v2 = vld [vmem:[#allocation4 + $0xb8] sm:$0xff]  ;;  %2305 = vmatpush.bf16.msra.mxu1 %v4772_v1  ;;  %v4779_v5 = vld [vmem:[#allocation4 + $0xb0] sm:$0xff]  ;;  %v4770_v7 = vld [vmem:[#allocation4 + $0x68] sm:$0xff] }
  0x11   :  { %2334 = vmatpush.bf16.msra.mxu2 %v4780_v2  ;;  %v4778_v8 = vld [vmem:[#allocation4 + $0xa8] sm:$0xff]  ;;  %v4761_v9 = vld [vmem:[#allocation4 + $0x20] sm:$0xff]  ;;  %v4760_v12 = vld [vmem:[#allocation4 + $0x18] sm:$0xff] }
  0x12   :  { %v4769_v10 = vld [vmem:[#allocation4 + $0x60] sm:$0xff]  ;;  %v4768_v13 = vld [vmem:[#allocation4 + $0x58] sm:$0xff]  ;;  %v4759_v15 = vld [vmem:[#allocation4 + $0x10] sm:$0xff] }
  0x13   :  { %2277 = vmatpush.bf16.msra.mxu0 %v4763_v3  ;;  %4964 = vmatpush.bf16.msra.mxu3 %v4763_v3  ;;  %v4777_v11 = vld [vmem:[#allocation4 + $0xa0] sm:$0xff]  ;;  %v4776_v14 = vld [vmem:[#allocation4 + $0x98] sm:$0xff]  ;;  %v4767_v16 = vld [vmem:[#allocation4 + $0x50] sm:$0xff] }
  0x14   :  { %2306 = vmatpush.bf16.msra.mxu1 %v4771_v4  ;;  %v4775_v17 = vld [vmem:[#allocation4 + $0x90] sm:$0xff]  ;;  %v4758_v18 = vld [vmem:[#allocation4 + $0x8] sm:$0xff]  ;;  %v4757_v21 = vld [vmem:[#allocation4] sm:$0xff] }
  0x15   :  { %2335 = vmatpush.bf16.msra.mxu2 %v4779_v5  ;;  %v4766_v19 = vld [vmem:[#allocation4 + $0x48] sm:$0xff]  ;;  %v4765_v22 = vld [vmem:[#allocation4 + $0x40] sm:$0xff]  ;;  %v3611_v26 = vld [vmem:[#allocation2 + $0x190] sm:$0xf] }
  0x16   :  { %v4774_v20 = vld [vmem:[#allocation4 + $0x88] sm:$0xff]  ;;  %v4773_v23 = vld [vmem:[#allocation4 + $0x80] sm:$0xff]  ;;  %v4719_v27 = vld [vmem:[#allocation2 + $0x1f0] sm:$0xf0] }
  0x17   :  { %2278 = vmatpush.bf16.msra.mxu0 %v4762_v6  ;;  %4965 = vmatpush.bf16.msra.mxu3 %v4762_v6  ;;  %v3411_v24 = vld [vmem:[#allocation2] sm:$0xf]  ;;  %v4669_v25 = vld [vmem:[#allocation2 + $0x60] sm:$0xf0]  ;;  %v3413_v29 = vld [vmem:[#allocation2 + $0x64] sm:$0xf0]  ;;  %v3612_v35 = vor.u32 %v4719_v27, %v3611_v26 }
  0x18   :  { %2307 = vmatpush.bf16.msra.mxu1 %v4770_v7  ;;  %v4657_v28 = vld [vmem:[#allocation2 + $0x4] sm:$0xf]  ;;  %v3419_v30 = vld [vmem:[#allocation2 + $0x8] sm:$0xf]  ;;  %v4670_v31 = vld [vmem:[#allocation2 + $0x68] sm:$0xf0]  ;;  %v3412_v34 = vor.u32 %v4669_v25, %v3411_v24 }
  0x19   :  { %2336 = vmatpush.bf16.msra.mxu2 %v4778_v8  ;;  %v4788_v32 = vld [vmem:[#allocation4 + $0xf8] sm:$0xff]  ;;  %v3416_v36 = vor.u32 %v4657_v28, %v3413_v29  ;;  %v3420_v37 = vor.u32 %v4670_v31, %v3419_v30  ;;  %v4787_v39 = vld [vmem:[#allocation4 + $0xf0] sm:$0xff]  ;;  %v4786_v44 = vld [vmem:[#allocation4 + $0xe8] sm:$0xff] }
  0x1a   :  { %v4796_v33 = vld [vmem:[#allocation4 + $0x138] sm:$0xff]  ;;  %v4795_v40 = vld [vmem:[#allocation4 + $0x130] sm:$0xff]  ;;  %v4794_v45 = vld [vmem:[#allocation4 + $0x128] sm:$0xff] }
  0x1b   :  { %2279 = vmatpush.bf16.msra.mxu0 %v4761_v9  ;;  %4966 = vmatpush.bf16.msra.mxu3 %v4761_v9  ;;  %v4812_v38 = vld [vmem:[#allocation4 + $0x1b8] sm:$0xff]  ;;  %v4803_v42 = vld [vmem:[#allocation4 + $0x170] sm:$0xff]  ;;  %v4802_v46 = vld [vmem:[#allocation4 + $0x168] sm:$0xff] }
  0x1c   :  { %2308 = vmatpush.bf16.msra.mxu1 %v4769_v10  ;;  %v4804_v41 = vld [vmem:[#allocation4 + $0x178] sm:$0xff]  ;;  %v4811_v43 = vld [vmem:[#allocation4 + $0x1b0] sm:$0xff]  ;;  %v4810_v47 = vld [vmem:[#allocation4 + $0x1a8] sm:$0xff] }
  0x1d   :  { %2337 = vmatpush.bf16.msra.mxu2 %v4777_v11  ;;  %v4785_v48 = vld [vmem:[#allocation4 + $0xe0] sm:$0xff]  ;;  %v3511_v50 = vld [vmem:[#allocation2 + $0xc8] sm:$0xf]  ;;  %v4694_v51 = vld [vmem:[#allocation2 + $0x128] sm:$0xf0] }
  0x1e   :  { %v4793_v49 = vld [vmem:[#allocation4 + $0x120] sm:$0xff]  ;;  %v3711_v52 = vld [vmem:[#allocation2 + $0x258] sm:$0xf]  ;;  %v4744_v53 = vld [vmem:[#allocation2 + $0x2b8] sm:$0xf0]  ;;  %v3512_v62 = vor.u32 %v4694_v51, %v3511_v50 }
  0x1f   :  { %2280 = vmatpush.bf16.msra.mxu0 %v4760_v12  ;;  %4967 = vmatpush.bf16.msra.mxu3 %v4760_v12  ;;  %v4682_v54 = vld [vmem:[#allocation2 + $0xcc] sm:$0xf]  ;;  %v3513_v55 = vld [vmem:[#allocation2 + $0x12c] sm:$0xf0]  ;;  %v4695_v57 = vld [vmem:[#allocation2 + $0x130] sm:$0xf0]  ;;  %v3712_v63 = vor.u32 %v4744_v53, %v3711_v52 }
  0x20   :  { %2309 = vmatpush.bf16.msra.mxu1 %v4768_v13  ;;  %v3519_v56 = vld [vmem:[#allocation2 + $0xd0] sm:$0xf]  ;;  %v4801_v58 = vld [vmem:[#allocation4 + $0x160] sm:$0xff]  ;;  %v4784_v60 = vld [vmem:[#allocation4 + $0xd8] sm:$0xff]  ;;  %v3516_v0 = vor.u32 %v4682_v54, %v3513_v55 }
  0x21   :  { %2338 = vmatpush.bf16.msra.mxu2 %v4776_v14  ;;  %v4809_v59 = vld [vmem:[#allocation4 + $0x1a0] sm:$0xff]  ;;  %v4792_v61 = vld [vmem:[#allocation4 + $0x118] sm:$0xff]  ;;  %v3520_v1 = vor.u32 %v4695_v57, %v3519_v56  ;;  %v4783_v2 = vld [vmem:[#allocation4 + $0xd0] sm:$0xff] }
  0x22   :  { %v4791_v3 = vld [vmem:[#allocation4 + $0x110] sm:$0xff]  ;;  %v4800_v4 = vld [vmem:[#allocation4 + $0x158] sm:$0xff]  ;;  %v4782_v8 = vld [vmem:[#allocation4 + $0xc8] sm:$0xff] }
  0x23   :  { %2281 = vmatpush.bf16.msra.mxu0 %v4759_v15  ;;  %4968 = vmatpush.bf16.msra.mxu3 %v4759_v15  ;;  %v4808_v5 = vld [vmem:[#allocation4 + $0x198] sm:$0xff]  ;;  %v4799_v6 = vld [vmem:[#allocation4 + $0x150] sm:$0xff]  ;;  %v4790_v9 = vld [vmem:[#allocation4 + $0x108] sm:$0xff] }
  0x24   :  { %2310 = vmatpush.bf16.msra.mxu1 %v4767_v16  ;;  %v4807_v7 = vld [vmem:[#allocation4 + $0x190] sm:$0xff]  ;;  %v4798_v10 = vld [vmem:[#allocation4 + $0x148] sm:$0xff]  ;;  %v4781_v12 = vld [vmem:[#allocation4 + $0xc0] sm:$0xff] }
  0x25   :  { %2339 = vmatpush.bf16.msra.mxu2 %v4775_v17  ;;  %v4806_v11 = vld [vmem:[#allocation4 + $0x188] sm:$0xff]  ;;  %v4789_v13 = vld [vmem:[#allocation4 + $0x100] sm:$0xff]  ;;  %v4707_v14 = vld [vmem:[#allocation2 + $0x194] sm:$0xf] }
  0x26   :  { %v3613_v15 = vld [vmem:[#allocation2 + $0x1f4] sm:$0xf0]  ;;  %v4658_v17 = vld [vmem:[#allocation2 + $0xc] sm:$0xf]  ;;  %v4797_v24 = vld [vmem:[#allocation4 + $0x140] sm:$0xff] }
  0x27   :  { %2282 = vmatpush.bf16.msra.mxu0 %v4758_v18  ;;  %4969 = vmatpush.bf16.msra.mxu3 %v4758_v18  ;;  %v3619_v16 = vld [vmem:[#allocation2 + $0x198] sm:$0xf]  ;;  %v4805_v25 = vld [vmem:[#allocation4 + $0x180] sm:$0xff]  ;;  %v3616_v28 = vor.u32 %v4707_v14, %v3613_v15  ;;  %v4819_v30 = vld [vmem:[#allocation4 + $0x1f0] sm:$0xff] }
  0x28   :  { %2311 = vmatpush.bf16.msra.mxu1 %v4766_v19  ;;  %v4820_v18 = vld [vmem:[#allocation4 + $0x1f8] sm:$0xff]  ;;  %v4827_v31 = vld [vmem:[#allocation4 + $0x230] sm:$0xff]  ;;  %v4814_v52 = vld [vmem:[#allocation4 + $0x1c8] sm:$0xff] }
  0x29   :  { %2340 = vmatpush.bf16.msra.mxu2 %v4774_v20  ;;  %v4828_v19 = vld [vmem:[#allocation4 + $0x238] sm:$0xff]  ;;  %v3421_v20 = vld [vmem:[#allocation2 + $0x6c] sm:$0xf0]  ;;  %v4822_v54 = vld [vmem:[#allocation4 + $0x208] sm:$0xff] }
  0x2a   :  { %v3424_v26 = vor.u32 %v4658_v17, %v3421_v20  ;;  %v4815_v50 = vld [vmem:[#allocation4 + $0x1d0] sm:$0xff]  ;;  %v4844_v53 = vld [vmem:[#allocation4 + $0x2b8] sm:$0xff]  ;;  %v4813_v55 = vld [vmem:[#allocation4 + $0x1c0] sm:$0xff] }
  0x2b   :  { %2283 = vmatpush.bf16.msra.mxu0 %v4757_v21  ;;  %4970 = vmatpush.bf16.msra.mxu3 %v4757_v21  ;;  %v3427_v21 = vld [vmem:[#allocation2 + $0x10] sm:$0xf]  ;;  %v4821_v56 = vld [vmem:[#allocation4 + $0x200] sm:$0xff]  ;;  %v4708_v57 = vld [vmem:[#allocation2 + $0x19c] sm:$0xf] }
  0x2c   :  { %2312 = vmatpush.bf16.msra.mxu1 %v4765_v22  ;;  %v4671_v22 = vld [vmem:[#allocation2 + $0x70] sm:$0xf0]  ;;  %v4733_v14 = vld [vmem:[#allocation2 + $0x264] sm:$0xf]  ;;  %v3721_v15 = vld [vmem:[#allocation2 + $0x2c4] sm:$0xf0] }
  0x2d   :  { %2341 = vmatpush.bf16.msra.mxu2 %v4773_v23  ;;  %v4720_v23 = vld [vmem:[#allocation2 + $0x1f8] sm:$0xf0]  ;;  %v3428_v27 = vor.u32 %v4671_v22, %v3427_v21  ;;  %v4823_v51 = vld [vmem:[#allocation4 + $0x210] sm:$0xff]  ;;  %v4746_v17 = vld [vmem:[#allocation2 + $0x2c8] sm:$0xf0] }
  0x2e   :  { %2284 = vmatmul.bf16.vlgmr.msra.gmra.mxu0 %v3412_v34  ;;  %2294 = vmatmul.bf16.vlgmr.msra.gmra.mxu3 %v3612_v35  ;;  %v3620_v29 = vor.u32 %v4720_v23, %v3619_v16  ;;  %v4817_v34 = vld [vmem:[#allocation4 + $0x1e0] sm:$0xff]  ;;  %v3727_v16 = vld [vmem:[#allocation2 + $0x268] sm:$0xf]  ;;  %v3724_v23 = vor.u32 %v4733_v14, %v3721_v15  ;;  %v4674_v14 = vld [vmem:[#allocation2 + $0x88] sm:$0xf0] }
  0x2f   :  { %2363 = vmatpush.bf16.msrb.mxu3 %v4788_v32  ;;  %2392 = vmatpush.bf16.msrb.mxu0 %v4796_v33  ;;  %v4818_v32 = vld [vmem:[#allocation4 + $0x1e8] sm:$0xff]  ;;  %v4825_v35 = vld [vmem:[#allocation4 + $0x220] sm:$0xff] }
  0x30   :  { %2313 = vmatmul.bf16.vlgmr.msra.gmra.mxu1 %v3416_v36  ;;  %2342 = vmatmul.bf16.vlgmr.msra.gmra.mxu2 %v3420_v37  ;;  %v4826_v33 = vld [vmem:[#allocation4 + $0x228] sm:$0xff]  ;;  %v4732_v36 = vld [vmem:[#allocation2 + $0x25c] sm:$0xf]  ;;  %v3713_v37 = vld [vmem:[#allocation2 + $0x2bc] sm:$0xf0] }
  0x31   :  { %2450 = vmatpush.bf16.msrb.mxu2 %v4812_v38  ;;  %2421 = vmatpush.bf16.msrb.mxu1 %v4804_v41  ;;  %v3719_v38 = vld [vmem:[#allocation2 + $0x260] sm:$0xf]  ;;  %v3527_v41 = vld [vmem:[#allocation2 + $0xd8] sm:$0xf]  ;;  %v4697_v21 = vld [vmem:[#allocation2 + $0x140] sm:$0xf0] }
  0x32   :  { %v3535_v20 = vld [vmem:[#allocation2 + $0xe0] sm:$0xf] }
  0x33   :  { %2364 = vmatpush.bf16.msrb.mxu3 %v4787_v39  ;;  %2393 = vmatpush.bf16.msrb.mxu0 %v4795_v40  ;;  %v4683_v39 = vld [vmem:[#allocation2 + $0xd4] sm:$0xf]  ;;  %v3521_v40 = vld [vmem:[#allocation2 + $0x134] sm:$0xf0]  ;;  %v4833_v22 = vld [vmem:[#allocation4 + $0x260] sm:$0xff] }
  0x35   :  { %2422 = vmatpush.bf16.msrb.mxu1 %v4803_v42  ;;  %2451 = vmatpush.bf16.msrb.mxu2 %v4811_v43  ;;  %v4696_v42 = vld [vmem:[#allocation2 + $0x138] sm:$0xf0]  ;;  %v4745_v43 = vld [vmem:[#allocation2 + $0x2c0] sm:$0xf0] }
  0x37   :  { %2365 = vmatpush.bf16.msrb.mxu3 %v4786_v44  ;;  %2394 = vmatpush.bf16.msrb.mxu0 %v4794_v45  ;;  %v4816_v44 = vld [vmem:[#allocation4 + $0x1d8] sm:$0xff] }
  0x38   :  { %v4824_v45 = vld [vmem:[#allocation4 + $0x218] sm:$0xff] }
  0x39   :  { %2423 = vmatpush.bf16.msrb.mxu1 %v4802_v46  ;;  %2452 = vmatpush.bf16.msrb.mxu2 %v4810_v47  ;;  %v3524_v46 = vor.u32 %v4683_v39, %v3521_v40  ;;  %v3528_v47 = vor.u32 %v4696_v42, %v3527_v41  ;;  %v3437_v39 = vld [vmem:[#allocation2 + $0x7c] sm:$0xf0]  ;;  %v4673_v41 = vld [vmem:[#allocation2 + $0x80] sm:$0xf0]  ;;  %v3629_v42 = vld [vmem:[#allocation2 + $0x204] sm:$0xf0] }
  0x3a   :  { %v3443_v40 = vld [vmem:[#allocation2 + $0x20] sm:$0xf] }
  0x3b   :  { %2366 = vmatpush.bf16.msrb.mxu3 %v4785_v48  ;;  %2395 = vmatpush.bf16.msrb.mxu0 %v4793_v49  ;;  %v3716_v48 = vor.u32 %v4732_v36, %v3713_v37  ;;  %v3720_v49 = vor.u32 %v4745_v43, %v3719_v38  ;;  %v4838_v36 = vld [vmem:[#allocation4 + $0x288] sm:$0xff]  ;;  %v4709_v37 = vld [vmem:[#allocation2 + $0x1a4] sm:$0xf]  ;;  %v4660_v38 = vld [vmem:[#allocation2 + $0x1c] sm:$0xf] }
  0x3c   :  { %v3635_v43 = vld [vmem:[#allocation2 + $0x1a8] sm:$0xf] }
  0x3d   :  { %2424 = vmatpush.bf16.msrb.mxu1 %v4801_v58  ;;  %2453 = vmatpush.bf16.msrb.mxu2 %v4809_v59  ;;  %v3621_v58 = vld [vmem:[#allocation2 + $0x1fc] sm:$0xf0] }
  0x3e   :  { %2289 = vmatmul.bf16.gmra.mxu0 %v3512_v62  ;;  %2299 = vmatmul.bf16.gmra.mxu3 %v3712_v63  ;;  %v3627_v59 = vld [vmem:[#allocation2 + $0x1a0] sm:$0xf]  ;;  %v3429_v62 = vld [vmem:[#allocation2 + $0x74] sm:$0xf0] }
  0x3f   :  { %2367 = vmatpush.bf16.msrb.mxu3 %v4784_v60  ;;  %2396 = vmatpush.bf16.msrb.mxu0 %v4792_v61  ;;  %v4721_v60 = vld [vmem:[#allocation2 + $0x200] sm:$0xf0]  ;;  %v4659_v61 = vld [vmem:[#allocation2 + $0x14] sm:$0xf]  ;;  %v3435_v63 = vld [vmem:[#allocation2 + $0x18] sm:$0xf] }
  0x40   :  { %2318 = vmatmul.bf16.gmra.mxu1 %v3516_v0  ;;  %2347 = vmatmul.bf16.gmra.mxu2 %v3520_v1  ;;  %v4672_v0 = vld [vmem:[#allocation2 + $0x78] sm:$0xf0]  ;;  %v3624_v1 = vor.u32 %v4708_v57, %v3621_v58  ;;  %v3537_v57 = vld [vmem:[#allocation2 + $0x144] sm:$0xf0] }
  0x41   :  { %2425 = vmatpush.bf16.msrb.mxu1 %v4800_v4  ;;  %2454 = vmatpush.bf16.msrb.mxu2 %v4808_v5  ;;  %v3436_v4 = vor.u32 %v4672_v0, %v3435_v63  ;;  %v4836_v5 = vld [vmem:[#allocation4 + $0x278] sm:$0xff]  ;;  %v3543_v58 = vld [vmem:[#allocation2 + $0xe8] sm:$0xf] }
  0x43   :  { %2368 = vmatpush.bf16.msrb.mxu3 %v4783_v2  ;;  %2397 = vmatpush.bf16.msrb.mxu0 %v4791_v3  ;;  %v3628_v2 = vor.u32 %v4721_v60, %v3627_v59  ;;  %v3432_v3 = vor.u32 %v4659_v61, %v3429_v62  ;;  %v4698_v59 = vld [vmem:[#allocation2 + $0x148] sm:$0xf0]  ;;  %v3729_v60 = vld [vmem:[#allocation2 + $0x2cc] sm:$0xf0]  ;;  %v4747_v62 = vld [vmem:[#allocation2 + $0x2d0] sm:$0xf0] }
  0x44   :  { %v3735_v61 = vld [vmem:[#allocation2 + $0x270] sm:$0xf]  ;;  %v3544_v0 = vor.u32 %v4698_v59, %v3543_v58  ;;  %v4864_v58 = vld [vmem:[#allocation4 + $0x358] sm:$0xff]  ;;  %v4882_v59 = vld [vmem:[#allocation4 + $0x3e8] sm:$0xff] }
  0x45   :  { %2426 = vmatpush.bf16.msrb.mxu1 %v4799_v6  ;;  %2455 = vmatpush.bf16.msrb.mxu2 %v4807_v7  ;;  %v4852_v6 = vld [vmem:[#allocation4 + $0x2f8] sm:$0xff]  ;;  %v4843_v7 = vld [vmem:[#allocation4 + $0x2b0] sm:$0xff] }
  0x47   :  { %2369 = vmatpush.bf16.msrb.mxu3 %v4782_v8  ;;  %2398 = vmatpush.bf16.msrb.mxu0 %v4790_v9  ;;  %v4835_v8 = vld [vmem:[#allocation4 + $0x270] sm:$0xff]  ;;  %v4860_v9 = vld [vmem:[#allocation4 + $0x338] sm:$0xff] }
  0x49   :  { %2427 = vmatpush.bf16.msrb.mxu1 %v4798_v10  ;;  %2456 = vmatpush.bf16.msrb.mxu2 %v4806_v11  ;;  %v4851_v10 = vld [vmem:[#allocation4 + $0x2f0] sm:$0xff]  ;;  %v4842_v11 = vld [vmem:[#allocation4 + $0x2a8] sm:$0xff] }
  0x4b   :  { %2370 = vmatpush.bf16.msrb.mxu3 %v4781_v12  ;;  %2399 = vmatpush.bf16.msrb.mxu0 %v4789_v13  ;;  %v4834_v12 = vld [vmem:[#allocation4 + $0x268] sm:$0xff]  ;;  %v4841_v13 = vld [vmem:[#allocation4 + $0x2a0] sm:$0xff] }
  0x4d   :  { %2428 = vmatpush.bf16.msrb.mxu1 %v4797_v24  ;;  %2457 = vmatpush.bf16.msrb.mxu2 %v4805_v25  ;;  %v3728_v24 = vor.u32 %v4746_v17, %v3727_v16  ;;  %v4853_v17 = vld [vmem:[#allocation4 + $0x300] sm:$0xff] }
  0x4e   :  { %2371 = vmatmul.bf16.vlgmr.msrb.gmra.mxu3 %v3424_v26  ;;  %2400 = vmatmul.bf16.vlgmr.msrb.gmra.mxu0 %v3428_v27  ;;  %v3536_v26 = vor.u32 %v4697_v21, %v3535_v20  ;;  %v4832_v27 = vld [vmem:[#allocation4 + $0x258] sm:$0xff] }
  0x4f   :  { %2479 = vmatpush.bf16.msra.mxu3 %v4820_v18  ;;  %2508 = vmatpush.bf16.msra.mxu0 %v4828_v19  ;;  %v4684_v18 = vld [vmem:[#allocation2 + $0xdc] sm:$0xf]  ;;  %v3529_v19 = vld [vmem:[#allocation2 + $0x13c] sm:$0xf0] }
  0x50   :  { %2323 = vmatmul.bf16.gmra.mxu1 %v3616_v28  ;;  %2352 = vmatmul.bf16.gmra.mxu2 %v3620_v29  ;;  %v3532_v25 = vor.u32 %v4684_v18, %v3529_v19  ;;  %v4840_v28 = vld [vmem:[#allocation4 + $0x298] sm:$0xff]  ;;  %v4850_v29 = vld [vmem:[#allocation4 + $0x2e8] sm:$0xff] }
  0x51   :  { %2566 = vmatpush.bf16.msra.mxu2 %v4844_v53  ;;  %2537 = vmatpush.bf16.msra.mxu1 %v4836_v5  ;;  %v4847_v53 = vld [vmem:[#allocation4 + $0x2d0] sm:$0xff]  ;;  %v4845_v5 = vld [vmem:[#allocation4 + $0x2c0] sm:$0xff] }
  0x53   :  { %2480 = vmatpush.bf16.msra.mxu3 %v4819_v30  ;;  %2509 = vmatpush.bf16.msra.mxu0 %v4827_v31  ;;  %v4859_v30 = vld [vmem:[#allocation4 + $0x330] sm:$0xff] }
  0x54   :  { %v4831_v31 = vld [vmem:[#allocation4 + $0x250] sm:$0xff] }
  0x55   :  { %2567 = vmatpush.bf16.msra.mxu2 %v4843_v7  ;;  %2538 = vmatpush.bf16.msra.mxu1 %v4835_v8  ;;  %v4710_v7 = vld [vmem:[#allocation2 + $0x1ac] sm:$0xf]  ;;  %v3637_v8 = vld [vmem:[#allocation2 + $0x20c] sm:$0xf0] }
  0x56   :  { %v3640_v15 = vor.u32 %v4710_v7, %v3637_v8  ;;  %v4890_v7 = vld [vmem:[#allocation4 + $0x428] sm:$0xff]  ;;  %v4711_v8 = vld [vmem:[#allocation2 + $0x1b4] sm:$0xf] }
  0x57   :  { %2481 = vmatpush.bf16.msra.mxu3 %v4818_v32  ;;  %2510 = vmatpush.bf16.msra.mxu0 %v4826_v33  ;;  %v4839_v32 = vld [vmem:[#allocation4 + $0x290] sm:$0xff]  ;;  %v4849_v33 = vld [vmem:[#allocation4 + $0x2e0] sm:$0xff] }
  0x59   :  { %2568 = vmatpush.bf16.msra.mxu2 %v4842_v11  ;;  %2539 = vmatpush.bf16.msra.mxu1 %v4834_v12  ;;  %v4661_v11 = vld [vmem:[#allocation2 + $0x24] sm:$0xf]  ;;  %v3445_v12 = vld [vmem:[#allocation2 + $0x84] sm:$0xf0] }
  0x5a   :  { %v3448_v19 = vor.u32 %v4661_v11, %v3445_v12  ;;  %v4870_v11 = vld [vmem:[#allocation4 + $0x388] sm:$0xff]  ;;  %v3453_v12 = vld [vmem:[#allocation2 + $0x8c] sm:$0xf0] }
  0x5b   :  { %2482 = vmatpush.bf16.msra.mxu3 %v4817_v34  ;;  %2511 = vmatpush.bf16.msra.mxu0 %v4825_v35  ;;  %v4858_v34 = vld [vmem:[#allocation4 + $0x328] sm:$0xff] }
  0x5c   :  { %v4830_v35 = vld [vmem:[#allocation4 + $0x248] sm:$0xff] }
  0x5d   :  { %2569 = vmatpush.bf16.msra.mxu2 %v4841_v13  ;;  %2540 = vmatpush.bf16.msra.mxu1 %v4833_v22  ;;  %v3451_v13 = vld [vmem:[#allocation2 + $0x28] sm:$0xf] }
  0x5e   :  { %2376 = vmatmul.bf16.gmra.mxu3 %v3524_v46  ;;  %2405 = vmatmul.bf16.gmra.mxu0 %v3528_v47  ;;  %v3444_v46 = vor.u32 %v4673_v41, %v3443_v40  ;;  %v4829_v47 = vld [vmem:[#allocation4 + $0x240] sm:$0xff]  ;;  %v3452_v20 = vor.u32 %v4674_v14, %v3451_v13  ;;  %v3743_v40 = vld [vmem:[#allocation2 + $0x278] sm:$0xf]  ;;  %v4748_v41 = vld [vmem:[#allocation2 + $0x2d8] sm:$0xf0] }
  0x5f   :  { %2483 = vmatpush.bf16.msra.mxu3 %v4816_v44  ;;  %2512 = vmatpush.bf16.msra.mxu0 %v4824_v45  ;;  %v4722_v44 = vld [vmem:[#allocation2 + $0x208] sm:$0xf0]  ;;  %v3440_v45 = vor.u32 %v4660_v38, %v3437_v39  ;;  %v3737_v38 = vld [vmem:[#allocation2 + $0x2d4] sm:$0xf0]  ;;  %v3459_v13 = vld [vmem:[#allocation2 + $0x30] sm:$0xf] }
  0x60   :  { %2328 = vmatmul.bf16.gmra.mxu1 %v3716_v48  ;;  %2357 = vmatmul.bf16.gmra.mxu2 %v3720_v49  ;;  %v4837_v48 = vld [vmem:[#allocation4 + $0x280] sm:$0xff]  ;;  %v3632_v49 = vor.u32 %v4709_v37, %v3629_v42  ;;  %v4735_v37 = vld [vmem:[#allocation2 + $0x274] sm:$0xf]  ;;  %v4874_v39 = vld [vmem:[#allocation4 + $0x3a8] sm:$0xff] }
  0x61   :  { %2541 = vmatpush.bf16.msra.mxu1 %v4832_v27  ;;  %2570 = vmatpush.bf16.msra.mxu2 %v4840_v28  ;;  %v4867_v28 = vld [vmem:[#allocation4 + $0x370] sm:$0xff]  ;;  %v4686_v42 = vld [vmem:[#allocation2 + $0xec] sm:$0xf] }
  0x62   :  { %v4675_v14 = vld [vmem:[#allocation2 + $0x90] sm:$0xf0] }
  0x63   :  { %2484 = vmatpush.bf16.msra.mxu3 %v4815_v50  ;;  %2513 = vmatpush.bf16.msra.mxu0 %v4823_v51  ;;  %v3636_v50 = vor.u32 %v4722_v44, %v3635_v43  ;;  %v4848_v51 = vld [vmem:[#allocation4 + $0x2d8] sm:$0xff]  ;;  %v3545_v43 = vld [vmem:[#allocation2 + $0x14c] sm:$0xf0] }
  0x64   :  { %v3551_v44 = vld [vmem:[#allocation2 + $0xf0] sm:$0xf] }
  0x65   :  { %2542 = vmatpush.bf16.msra.mxu1 %v4831_v31  ;;  %2571 = vmatpush.bf16.msra.mxu2 %v4839_v32 }
  0x67   :  { %2485 = vmatpush.bf16.msra.mxu3 %v4814_v52  ;;  %2514 = vmatpush.bf16.msra.mxu0 %v4822_v54  ;;  %v4857_v52 = vld [vmem:[#allocation4 + $0x320] sm:$0xff]  ;;  %v4856_v54 = vld [vmem:[#allocation4 + $0x318] sm:$0xff] }
  0x69   :  { %2543 = vmatpush.bf16.msra.mxu1 %v4830_v35  ;;  %2572 = vmatpush.bf16.msra.mxu2 %v4838_v36  ;;  %v4892_v35 = vld [vmem:[#allocation4 + $0x438] sm:$0xff]  ;;  %v4866_v36 = vld [vmem:[#allocation4 + $0x368] sm:$0xff] }
  0x6b   :  { %2486 = vmatpush.bf16.msra.mxu3 %v4813_v55  ;;  %2515 = vmatpush.bf16.msra.mxu0 %v4821_v56  ;;  %v4734_v55 = vld [vmem:[#allocation2 + $0x26c] sm:$0xf]  ;;  %v4685_v56 = vld [vmem:[#allocation2 + $0xe4] sm:$0xf] }
  0x6c   :  { %v3540_v63 = vor.u32 %v4685_v56, %v3537_v57 }
  0x6d   :  { %2544 = vmatpush.bf16.msra.mxu1 %v4829_v47  ;;  %2573 = vmatpush.bf16.msra.mxu2 %v4837_v48  ;;  %v3740_v48 = vor.u32 %v4735_v37, %v3737_v38 }
  0x6e   :  { %2381 = vmatmul.bf16.gmra.mxu3 %v3624_v1  ;;  %2410 = vmatmul.bf16.gmra.mxu0 %v3628_v2  ;;  %v3732_v1 = vor.u32 %v4734_v55, %v3729_v60  ;;  %v3736_v2 = vor.u32 %v4747_v62, %v3735_v61  ;;  %v4891_v60 = vld [vmem:[#allocation4 + $0x430] sm:$0xff]  ;;  %v4872_v61 = vld [vmem:[#allocation4 + $0x398] sm:$0xff] }
  0x6f   :  { %2595 = vmatpush.bf16.msrb.mxu3 %v4852_v6  ;;  %2624 = vmatpush.bf16.msrb.mxu0 %v4860_v9  ;;  %v4854_v6 = vld [vmem:[#allocation4 + $0x308] sm:$0xff]  ;;  %v3643_v9 = vld [vmem:[#allocation2 + $0x1b0] sm:$0xf] }
  0x70   :  { %2429 = vmatmul.bf16.vlgmr.msrb.gmra.mxu1 %v3432_v3  ;;  %2458 = vmatmul.bf16.vlgmr.msrb.gmra.mxu2 %v3436_v4  ;;  %v4846_v3 = vld [vmem:[#allocation4 + $0x2c8] sm:$0xff]  ;;  %v4855_v4 = vld [vmem:[#allocation4 + $0x310] sm:$0xff] }
  0x73   :  { %2596 = vmatpush.bf16.msrb.mxu3 %v4851_v10  ;;  %2625 = vmatpush.bf16.msrb.mxu0 %v4859_v30  ;;  %v4723_v10 = vld [vmem:[#allocation2 + $0x210] sm:$0xf0] }
  0x74   :  { %v3644_v16 = vor.u32 %v4723_v10, %v3643_v9  ;;  %v4662_v9 = vld [vmem:[#allocation2 + $0x2c] sm:$0xf] }
  0x75   :  { %v4862_v10 = vld [vmem:[#allocation4 + $0x348] sm:$0xff] }
  0x77   :  { %2597 = vmatpush.bf16.msrb.mxu3 %v4850_v29  ;;  %2626 = vmatpush.bf16.msrb.mxu0 %v4858_v34  ;;  %v4875_v29 = vld [vmem:[#allocation4 + $0x3b0] sm:$0xff] }
  0x78   :  { %v4883_v34 = vld [vmem:[#allocation4 + $0x3f0] sm:$0xff] }
  0x7b   :  { %2598 = vmatpush.bf16.msrb.mxu3 %v4849_v33  ;;  %2627 = vmatpush.bf16.msrb.mxu0 %v4857_v52 }
  0x7e   :  { %2386 = vmatmul.bf16.gmra.mxu3 %v3724_v23  ;;  %2415 = vmatmul.bf16.gmra.mxu0 %v3728_v24  ;;  %v4876_v23 = vld [vmem:[#allocation4 + $0x3b8] sm:$0xff] }
  0x7f   :  { %2599 = vmatpush.bf16.msrb.mxu3 %v4848_v51  ;;  %2628 = vmatpush.bf16.msrb.mxu0 %v4856_v54  ;;  %v4884_v24 = vld [vmem:[#allocation4 + $0x3f8] sm:$0xff]  ;;  %v4873_v51 = vld [vmem:[#allocation4 + $0x3a0] sm:$0xff]  ;;  %v3548_v54 = vor.u32 %v4686_v42, %v3545_v43 }
  0x80   :  { %2434 = vmatmul.bf16.gmra.mxu1 %v3532_v25  ;;  %2463 = vmatmul.bf16.gmra.mxu2 %v3536_v26  ;;  %v4868_v25 = vld [vmem:[#allocation4 + $0x378] sm:$0xff] }
  0x81   :  { %2682 = vmatpush.bf16.msrb.mxu2 %v4876_v23  ;;  %2653 = vmatpush.bf16.msrb.mxu1 %v4868_v25  ;;  %v4888_v42 = vld [vmem:[#allocation4 + $0x418] sm:$0xff] }
  0x82   :  { %v4736_v43 = vld [vmem:[#allocation2 + $0x27c] sm:$0xf] }
  0x83   :  { %2600 = vmatpush.bf16.msrb.mxu3 %v4847_v53  ;;  %2629 = vmatpush.bf16.msrb.mxu0 %v4855_v4 }
  0x85   :  { %2683 = vmatpush.bf16.msrb.mxu2 %v4875_v29  ;;  %2654 = vmatpush.bf16.msrb.mxu1 %v4867_v28  ;;  %v4861_v28 = vld [vmem:[#allocation4 + $0x340] sm:$0xff] }
  0x86   :  { %v4869_v29 = vld [vmem:[#allocation4 + $0x380] sm:$0xff] }
  0x87   :  { %2601 = vmatpush.bf16.msrb.mxu3 %v4846_v3  ;;  %2630 = vmatpush.bf16.msrb.mxu0 %v4854_v6  ;;  %v4881_v6 = vld [vmem:[#allocation4 + $0x3e0] sm:$0xff] }
  0x89   :  { %2684 = vmatpush.bf16.msrb.mxu2 %v4874_v39  ;;  %2655 = vmatpush.bf16.msrb.mxu1 %v4866_v36 }
  0x8b   :  { %2602 = vmatpush.bf16.msrb.mxu3 %v4845_v5  ;;  %2631 = vmatpush.bf16.msrb.mxu0 %v4853_v17  ;;  %v4724_v17 = vld [vmem:[#allocation2 + $0x218] sm:$0xf0] }
  0x8d   :  { %2685 = vmatpush.bf16.msrb.mxu2 %v4873_v51 }
  0x8e   :  { %2487 = vmatmul.bf16.vlgmr.msra.gmra.mxu3 %v3440_v45  ;;  %2516 = vmatmul.bf16.vlgmr.msra.gmra.mxu0 %v3444_v46  ;;  %v4699_v45 = vld [vmem:[#allocation2 + $0x150] sm:$0xf0] }
  0x8f   :  { %2711 = vmatpush.bf16.msra.mxu3 %v4884_v24  ;;  %2740 = vmatpush.bf16.msra.mxu0 %v4892_v35  ;;  %v3552_v55 = vor.u32 %v4699_v45, %v3551_v44  ;;  %v4687_v44 = vld [vmem:[#allocation2 + $0xf4] sm:$0xf]  ;;  %v3553_v45 = vld [vmem:[#allocation2 + $0x154] sm:$0xf0] }
  0x90   :  { %2439 = vmatmul.bf16.gmra.mxu1 %v3632_v49  ;;  %2468 = vmatmul.bf16.gmra.mxu2 %v3636_v50  ;;  %v3744_v49 = vor.u32 %v4748_v41, %v3743_v40  ;;  %v4865_v50 = vld [vmem:[#allocation4 + $0x360] sm:$0xff]  ;;  %v4879_v41 = vld [vmem:[#allocation4 + $0x3d0] sm:$0xff] }
  0x91   :  { %2656 = vmatpush.bf16.msrb.mxu1 %v4865_v50  ;;  %2686 = vmatpush.bf16.msrb.mxu2 %v4872_v61  ;;  %v3751_v50 = vld [vmem:[#allocation2 + $0x280] sm:$0xf] }
  0x93   :  { %2712 = vmatpush.bf16.msra.mxu3 %v4883_v34  ;;  %2741 = vmatpush.bf16.msra.mxu0 %v4891_v60 }
  0x95   :  { %2657 = vmatpush.bf16.msrb.mxu1 %v4864_v58 }
  0x97   :  { %2713 = vmatpush.bf16.msra.mxu3 %v4882_v59  ;;  %2742 = vmatpush.bf16.msra.mxu0 %v4890_v7 }
  0x9b   :  { %2714 = vmatpush.bf16.msra.mxu3 %v4881_v6 }
  0x9e   :  { %2492 = vmatmul.bf16.gmra.mxu3 %v3540_v63  ;;  %2521 = vmatmul.bf16.gmra.mxu0 %v3544_v0  ;;  %v4863_v0 = vld [vmem:[#allocation4 + $0x350] sm:$0xff] }
  0x9f   :  { %2658 = vmatpush.bf16.msrb.mxu1 %v4863_v0  ;;  %v4878_v0 = vld [vmem:[#allocation4 + $0x3c8] sm:$0xff] }
  0xa0   :  { %2444 = vmatmul.bf16.gmra.mxu1 %v3732_v1  ;;  %2473 = vmatmul.bf16.gmra.mxu2 %v3736_v2  ;;  %v4871_v1 = vld [vmem:[#allocation4 + $0x390] sm:$0xff] }
  0xa1   :  { %2687 = vmatpush.bf16.msrb.mxu2 %v4871_v1  ;;  %v4887_v1 = vld [vmem:[#allocation4 + $0x410] sm:$0xff] }
  0xa3   :  { %2659 = vmatpush.bf16.msrb.mxu1 %v4862_v10  ;;  %v4886_v10 = vld [vmem:[#allocation4 + $0x408] sm:$0xff] }
  0xa5   :  { %2688 = vmatpush.bf16.msrb.mxu2 %v4870_v11  ;;  %v4712_v11 = vld [vmem:[#allocation2 + $0x1bc] sm:$0xf] }
  0xa7   :  { %2660 = vmatpush.bf16.msrb.mxu1 %v4861_v28 }
  0xa9   :  { %2689 = vmatpush.bf16.msrb.mxu2 %v4869_v29 }
  0xab   :  { %v2285_v18 = vpop.f32.mrf.mxu0 }
  0xad   :  { %v2314_v21 = vpop.f32.mrf.mxu1 }
  0xae   :  { %v2315_v22 = vadd.f32 %v2314_v21, %v2285_v18  ;;  %2497 = vmatmul.bf16.gmra.mxu3 %v3640_v15  ;;  %2526 = vmatmul.bf16.gmra.mxu0 %v3644_v16  ;;  %v3645_v15 = vld [vmem:[#allocation2 + $0x214] sm:$0xf0]  ;;  %v3460_v21 = vor.u32 %v4675_v14, %v3459_v13  ;;  %v3659_v13 = vld [vmem:[#allocation2 + $0x1c0] sm:$0xf]  ;;  %v4725_v14 = vld [vmem:[#allocation2 + $0x220] sm:$0xf0] }
  0xaf   :  { %v3651_v16 = vld [vmem:[#allocation2 + $0x1b8] sm:$0xf]  ;;  %v3648_v24 = vor.u32 %v4711_v8, %v3645_v15  ;;  %v4663_v15 = vld [vmem:[#allocation2 + $0x34] sm:$0xf] }
  0xb0   :  { %2545 = vmatmul.bf16.vlgmr.msra.gmra.mxu1 %v3448_v19  ;;  %2574 = vmatmul.bf16.vlgmr.msra.gmra.mxu2 %v3452_v20  ;;  %v3456_v20 = vor.u32 %v4662_v9, %v3453_v12  ;;  %v3652_v25 = vor.u32 %v4724_v17, %v3651_v16  ;;  %v4877_v9 = vld [vmem:[#allocation4 + $0x3c0] sm:$0xff]  ;;  %v3461_v16 = vld [vmem:[#allocation2 + $0x94] sm:$0xf0] }
  0xb1   :  { %v5152_v26 = vpop.f32.mrf.mxu3  ;;  %v3653_v12 = vld [vmem:[#allocation2 + $0x21c] sm:$0xf0]  ;;  %v3467_v17 = vld [vmem:[#allocation2 + $0x38] sm:$0xf]  ;;  %v3464_v28 = vor.u32 %v4663_v15, %v3461_v16  ;;  %v4895_v16 = vld [vmem:[#allocation4 + $0x450] sm:$0xff] }
  0xb3   :  { %v2343_v27 = vpop.f32.mrf.mxu2  ;;  %v2287_v31 = vpop.f32.mrf.mxu0 }
  0xb4   :  { %v5154_v30 = vadd.f32 %v2343_v27, %v2315_v22 }
  0xb5   :  { %v2316_v32 = vpop.f32.mrf.mxu1 }
  0xb6   :  { %v2317_v33 = vadd.f32 %v2316_v32, %v2287_v31  ;;  %v4880_v32 = vld [vmem:[#allocation4 + $0x3d8] sm:$0xff] }
  0xb7   :  { %2715 = vmatpush.bf16.msra.mxu3 %v4880_v32 }
  0xb9   :  { %v5156_v46 = vpop.f32.mrf.mxu3 }
  0xbb   :  { %v2345_v47 = vpop.f32.mrf.mxu2  ;;  %v2290_v53 = vpop.f32.mrf.mxu0  ;;  %2716 = vmatpush.bf16.msra.mxu3 %v4879_v41  ;;  %v4907_v41 = vld [vmem:[#allocation4 + $0x4b0] sm:$0xff] }
  0xbc   :  { %v5158_v52 = vadd.f32 %v2345_v47, %v2317_v33  ;;  %v4889_v33 = vld [vmem:[#allocation4 + $0x420] sm:$0xff]  ;;  %v3559_v47 = vld [vmem:[#allocation2 + $0xf8] sm:$0xf] }
  0xbd   :  { %v2319_v56 = vpop.f32.mrf.mxu1  ;;  %2743 = vmatpush.bf16.msra.mxu0 %v4889_v33 }
  0xbe   :  { %v2320_v57 = vadd.f32 %v2319_v56, %v2290_v53  ;;  %2502 = vmatmul.bf16.gmra.mxu3 %v3740_v48  ;;  %2531 = vmatmul.bf16.gmra.mxu0 %v3744_v49  ;;  %v4700_v48 = vld [vmem:[#allocation2 + $0x158] sm:$0xf0]  ;;  %v3745_v49 = vld [vmem:[#allocation2 + $0x2dc] sm:$0xf0] }
  0xbf   :  { %v3560_v56 = vor.u32 %v4700_v48, %v3559_v47  ;;  %v3748_v58 = vor.u32 %v4736_v43, %v3745_v49  ;;  %2717 = vmatpush.bf16.msra.mxu3 %v4878_v0  ;;  %v4915_v47 = vld [vmem:[#allocation4 + $0x4f0] sm:$0xff]  ;;  %v4924_v48 = vld [vmem:[#allocation4 + $0x538] sm:$0xff]  ;;  %v4898_v49 = vld [vmem:[#allocation4 + $0x468] sm:$0xff] }
  0xc0   :  { %2550 = vmatmul.bf16.gmra.mxu1 %v3548_v54  ;;  %2579 = vmatmul.bf16.gmra.mxu2 %v3552_v55  ;;  %v3556_v55 = vor.u32 %v4687_v44, %v3553_v45  ;;  %v4897_v0 = vld [vmem:[#allocation4 + $0x460] sm:$0xff] }
  0xc1   :  { %v5160_v62 = vpop.f32.mrf.mxu3  ;;  %2744 = vmatpush.bf16.msra.mxu0 %v4888_v42 }
  0xc3   :  { %v2348_v63 = vpop.f32.mrf.mxu2  ;;  %v2292_v3 = vpop.f32.mrf.mxu0  ;;  %2718 = vmatpush.bf16.msra.mxu3 %v4877_v9 }
  0xc4   :  { %v5162_v2 = vadd.f32 %v2348_v63, %v2320_v57 }
  0xc5   :  { %v2321_v4 = vpop.f32.mrf.mxu1  ;;  %2745 = vmatpush.bf16.msra.mxu0 %v4887_v1  ;;  %v4905_v1 = vld [vmem:[#allocation4 + $0x4a0] sm:$0xff] }
  0xc6   :  { %v2322_v5 = vadd.f32 %v2321_v4, %v2292_v3 }
  0xc9   :  { %v5164_v18 = vpop.f32.mrf.mxu3  ;;  %2746 = vmatpush.bf16.msra.mxu0 %v4886_v10  ;;  %v4914_v10 = vld [vmem:[#allocation4 + $0x4e8] sm:$0xff] }
  0xcb   :  { %v2350_v19 = vpop.f32.mrf.mxu2  ;;  %v2401_v23 = vpop.f32.mrf.mxu0 }
  0xcc   :  { %v5166_v22 = vadd.f32 %v2350_v19, %v2322_v5 }
  0xcd   :  { %v2324_v27 = vpop.f32.mrf.mxu1 }
  0xce   :  { %v2325_v31 = vadd.f32 %v2324_v27, %v5152_v26  ;;  %2603 = vmatmul.bf16.vlgmr.msrb.gmra.mxu3 %v3456_v20  ;;  %2632 = vmatmul.bf16.vlgmr.msrb.gmra.mxu0 %v3460_v21 }
  0xd0   :  { %2555 = vmatmul.bf16.gmra.mxu1 %v3648_v24  ;;  %2584 = vmatmul.bf16.gmra.mxu2 %v3652_v25  ;;  %v3660_v24 = vor.u32 %v4725_v14, %v3659_v13  ;;  %v4885_v25 = vld [vmem:[#allocation4 + $0x400] sm:$0xff] }
  0xd1   :  { %v2372_v34 = vpop.f32.mrf.mxu3  ;;  %2747 = vmatpush.bf16.msra.mxu0 %v4885_v25  ;;  %v4713_v25 = vld [vmem:[#allocation2 + $0x1c4] sm:$0xf] }
  0xd2   :  { %v2373_v36 = vadd.f32 %v2372_v34, %v5154_v30  ;;  %v4749_v30 = vld [vmem:[#allocation2 + $0x2e0] sm:$0xf0]  ;;  %v4908_v34 = vld [vmem:[#allocation4 + $0x4b8] sm:$0xff] }
  0xd3   :  { %v2353_v35 = vpop.f32.mrf.mxu2  ;;  %v2403_v38 = vpop.f32.mrf.mxu0  ;;  %v3752_v59 = vor.u32 %v4749_v30, %v3751_v50  ;;  %2798 = vmatpush.bf16.msra.mxu2 %v4908_v34  ;;  %v4737_v50 = vld [vmem:[#allocation2 + $0x284] sm:$0xf]  ;;  %v3753_v30 = vld [vmem:[#allocation2 + $0x2e4] sm:$0xf0] }
  0xd4   :  { %v5170_v37 = vadd.f32 %v2353_v35, %v2325_v31  ;;  %v5172_v40 = vadd.f32 %v2401_v23, %v2373_v36  ;;  %v3656_v23 = vor.u32 %v4712_v11, %v3653_v12  ;;  %v4900_v35 = vld [vmem:[#allocation4 + $0x478] sm:$0xff]  ;;  %v4923_v11 = vld [vmem:[#allocation4 + $0x530] sm:$0xff]  ;;  %v3661_v34 = vld [vmem:[#allocation2 + $0x224] sm:$0xf0] }
  0xd5   :  { %v2326_v39 = vpop.f32.mrf.mxu1  ;;  %2769 = vmatpush.bf16.msra.mxu1 %v4900_v35  ;;  %2856 = vmatpush.bf16.msrb.mxu0 %v4924_v48  ;;  %v4904_v12 = vld [vmem:[#allocation4 + $0x498] sm:$0xff]  ;;  %v4726_v35 = vld [vmem:[#allocation2 + $0x228] sm:$0xf0] }
  0xd6   :  { %v2327_v26 = vadd.f32 %v2326_v39, %v5156_v46 }
  0xd7   :  { %2799 = vmatpush.bf16.msra.mxu2 %v4907_v41 }
  0xd9   :  { %v2374_v51 = vpop.f32.mrf.mxu3  ;;  %2857 = vmatpush.bf16.msrb.mxu0 %v4923_v11 }
  0xda   :  { %v2375_v54 = vadd.f32 %v2374_v51, %v5158_v52  ;;  %v4906_v51 = vld [vmem:[#allocation4 + $0x4a8] sm:$0xff] }
  0xdb   :  { %v2355_v53 = vpop.f32.mrf.mxu2  ;;  %v2406_v46 = vpop.f32.mrf.mxu0  ;;  %2800 = vmatpush.bf16.msra.mxu2 %v4906_v51  ;;  %v4921_v51 = vld [vmem:[#allocation4 + $0x520] sm:$0xff] }
  0xdc   :  { %v5176_v57 = vadd.f32 %v2355_v53, %v2327_v26  ;;  %v5178_v61 = vadd.f32 %v2403_v38, %v2375_v54  ;;  %v4899_v26 = vld [vmem:[#allocation4 + $0x470] sm:$0xff]  ;;  %v4750_v53 = vld [vmem:[#allocation2 + $0x2e8] sm:$0xf0]  ;;  %v4688_v54 = vld [vmem:[#allocation2 + $0xfc] sm:$0xf] }
  0xdd   :  { %v2329_v60 = vpop.f32.mrf.mxu1  ;;  %2770 = vmatpush.bf16.msra.mxu1 %v4899_v26 }
  0xde   :  { %v2330_v63 = vadd.f32 %v2329_v60, %v5160_v62  ;;  %2608 = vmatmul.bf16.gmra.mxu3 %v3556_v55  ;;  %2637 = vmatmul.bf16.gmra.mxu0 %v3560_v56  ;;  %v3561_v55 = vld [vmem:[#allocation2 + $0x15c] sm:$0xf0] }
  0xdf   :  { %v3567_v56 = vld [vmem:[#allocation2 + $0x100] sm:$0xf]  ;;  %2801 = vmatpush.bf16.msra.mxu2 %v4905_v1  ;;  %v3575_v1 = vld [vmem:[#allocation2 + $0x108] sm:$0xf] }
  0xe0   :  { %2560 = vmatmul.bf16.gmra.mxu1 %v3748_v58  ;;  %2589 = vmatmul.bf16.gmra.mxu2 %v3752_v59 }
  0xe1   :  { %v2377_v3 = vpop.f32.mrf.mxu3  ;;  %2771 = vmatpush.bf16.msra.mxu1 %v4898_v49  ;;  %v4893_v49 = vld [vmem:[#allocation4 + $0x440] sm:$0xff] }
  0xe2   :  { %v2378_v4 = vadd.f32 %v2377_v3, %v5162_v2  ;;  %v4676_v2 = vld [vmem:[#allocation2 + $0x98] sm:$0xf0] }
  0xe3   :  { %v2358_v52 = vpop.f32.mrf.mxu2  ;;  %v2408_v6 = vpop.f32.mrf.mxu0  ;;  %v3468_v29 = vor.u32 %v4676_v2, %v3467_v17  ;;  %2802 = vmatpush.bf16.msra.mxu2 %v4904_v12  ;;  %v4903_v17 = vld [vmem:[#allocation4 + $0x490] sm:$0xff] }
  0xe4   :  { %v5182_v5 = vadd.f32 %v2358_v52, %v2330_v63  ;;  %v5184_v8 = vadd.f32 %v2406_v46, %v2378_v4  ;;  %v4701_v46 = vld [vmem:[#allocation2 + $0x160] sm:$0xf0]  ;;  %v3564_v4 = vor.u32 %v4688_v54, %v3561_v55 }
  0xe5   :  { %v2331_v7 = vpop.f32.mrf.mxu1  ;;  %2772 = vmatpush.bf16.msra.mxu1 %v4897_v0  ;;  %v3569_v0 = vld [vmem:[#allocation2 + $0x164] sm:$0xf0] }
  0xe6   :  { %v2332_v62 = vadd.f32 %v2331_v7, %v5164_v18 }
  0xe7   :  { %2803 = vmatpush.bf16.msra.mxu2 %v4903_v17 }
  0xe9   :  { %v2379_v19 = vpop.f32.mrf.mxu3 }
  0xea   :  { %v2380_v21 = vadd.f32 %v2379_v19, %v5166_v22  ;;  %v4916_v22 = vld [vmem:[#allocation4 + $0x4f8] sm:$0xff] }
  0xeb   :  { %v2360_v20 = vpop.f32.mrf.mxu2  ;;  %v2411_v27 = vpop.f32.mrf.mxu0  ;;  %2827 = vmatpush.bf16.msrb.mxu3 %v4916_v22  ;;  %v3667_v22 = vld [vmem:[#allocation2 + $0x1c8] sm:$0xf] }
  0xec   :  { %v5188_v18 = vadd.f32 %v2360_v20, %v2332_v62  ;;  %v5190_v32 = vadd.f32 %v2408_v6, %v2380_v21  ;;  %v3568_v6 = vor.u32 %v4701_v46, %v3567_v56 }
  0xed   :  { %v2430_v31 = vpop.f32.mrf.mxu1 }
  0xee   :  { %v2431_v33 = vadd.f32 %v2430_v31, %v5172_v40  ;;  %2613 = vmatmul.bf16.gmra.mxu3 %v3656_v23  ;;  %2642 = vmatmul.bf16.gmra.mxu0 %v3660_v24  ;;  %v4913_v23 = vld [vmem:[#allocation4 + $0x4e0] sm:$0xff]  ;;  %v4922_v24 = vld [vmem:[#allocation4 + $0x528] sm:$0xff] }
  0xef   :  { %2828 = vmatpush.bf16.msrb.mxu3 %v4915_v47  ;;  %v3475_v31 = vld [vmem:[#allocation2 + $0x40] sm:$0xf]  ;;  %2858 = vmatpush.bf16.msrb.mxu0 %v4922_v24 }
  0xf0   :  { %2661 = vmatmul.bf16.vlgmr.msrb.gmra.mxu1 %v3464_v28  ;;  %2690 = vmatmul.bf16.vlgmr.msrb.gmra.mxu2 %v3468_v29  ;;  %v4902_v28 = vld [vmem:[#allocation4 + $0x488] sm:$0xff]  ;;  %v3469_v29 = vld [vmem:[#allocation2 + $0x9c] sm:$0xf0] }
  0xf1   :  { %v2382_v36 = vpop.f32.mrf.mxu3  ;;  %2804 = vmatpush.bf16.msra.mxu2 %v4902_v28 }
  0xf2   :  { %v2383_v38 = vadd.f32 %v2382_v36, %v5170_v37  ;;  %v3759_v37 = vld [vmem:[#allocation2 + $0x288] sm:$0xf] }
  0xf3   :  { %v2459_v39 = vpop.f32.mrf.mxu2  ;;  %v2413_v43 = vpop.f32.mrf.mxu0  ;;  %v3760_v63 = vor.u32 %v4750_v53, %v3759_v37  ;;  %2829 = vmatpush.bf16.msrb.mxu3 %v4914_v10  ;;  %2859 = vmatpush.bf16.msrb.mxu0 %v4921_v51 }
  0xf4   :  { %v5194_v42 = vadd.f32 %v2459_v39, %v2431_v33  ;;  %v5196_v44 = vadd.f32 %v2411_v27, %v2383_v38  ;;  %v4664_v27 = vld [vmem:[#allocation2 + $0x3c] sm:$0xf]  ;;  %v4677_v33 = vld [vmem:[#allocation2 + $0xa0] sm:$0xf0] }
  0xf5   :  { %v2432_v40 = vpop.f32.mrf.mxu1  ;;  %v3472_v39 = vor.u32 %v4664_v27, %v3469_v29  ;;  %v3476_v26 = vor.u32 %v4677_v33, %v3475_v31  ;;  %v4918_v29 = vld [vmem:[#allocation4 + $0x508] sm:$0xff]  ;;  %v3669_v33 = vld [vmem:[#allocation2 + $0x22c] sm:$0xf0] }
  0xf6   :  { %v2433_v45 = vadd.f32 %v2432_v40, %v5178_v61  ;;  %v3756_v61 = vor.u32 %v4737_v50, %v3753_v30  ;;  %v3664_v40 = vor.u32 %v4713_v25, %v3661_v34  ;;  %v4901_v50 = vld [vmem:[#allocation4 + $0x480] sm:$0xff]  ;;  %v4714_v31 = vld [vmem:[#allocation2 + $0x1cc] sm:$0xf]  ;;  %v3675_v34 = vld [vmem:[#allocation2 + $0x1d0] sm:$0xf] }
  0xf7   :  { %2830 = vmatpush.bf16.msrb.mxu3 %v4913_v23  ;;  %2805 = vmatpush.bf16.msra.mxu2 %v4901_v50 }
  0xf9   :  { %v2384_v58 = vpop.f32.mrf.mxu3 }
  0xfa   :  { %v2385_v59 = vadd.f32 %v2384_v58, %v5176_v57  ;;  %v4896_v57 = vld [vmem:[#allocation4 + $0x458] sm:$0xff] }
  0xfb   :  { %v2461_v60 = vpop.f32.mrf.mxu2  ;;  %v2416_v52 = vpop.f32.mrf.mxu0  ;;  %2773 = vmatpush.bf16.msra.mxu1 %v4896_v57 }
  0xfc   :  { %v5200_v3 = vadd.f32 %v2461_v60, %v2433_v45  ;;  %v5202_v62 = vadd.f32 %v2413_v43, %v2385_v59  ;;  %v3668_v45 = vor.u32 %v4726_v35, %v3667_v22  ;;  %v4911_v59 = vld [vmem:[#allocation4 + $0x4d0] sm:$0xff]  ;;  %v4920_v60 = vld [vmem:[#allocation4 + $0x518] sm:$0xff]  ;;  %v4665_v35 = vld [vmem:[#allocation2 + $0x44] sm:$0xf] }
  0xfd   :  { %v2435_v7 = vpop.f32.mrf.mxu1  ;;  %2860 = vmatpush.bf16.msrb.mxu0 %v4920_v60  ;;  %v4727_v22 = vld [vmem:[#allocation2 + $0x230] sm:$0xf0] }
  0xfe   :  { %v2436_v9 = vadd.f32 %v2435_v7, %v5184_v8  ;;  %2618 = vmatmul.bf16.gmra.mxu3 %v3756_v61  ;;  %2647 = vmatmul.bf16.gmra.mxu0 %v3760_v63  ;;  %v4738_v61 = vld [vmem:[#allocation2 + $0x28c] sm:$0xf]  ;;  %v4689_v63 = vld [vmem:[#allocation2 + $0x104] sm:$0xf] }
  0xff   :  { %2774 = vmatpush.bf16.msra.mxu1 %v4895_v16  ;;  %v3572_v10 = vor.u32 %v4689_v63, %v3569_v0 }
 0x100   :  { %2666 = vmatmul.bf16.gmra.mxu1 %v3564_v4  ;;  %2695 = vmatmul.bf16.gmra.mxu2 %v3568_v6  ;;  %v3761_v4 = vld [vmem:[#allocation2 + $0x2ec] sm:$0xf0] }
 0x101   :  { %v2387_v13 = vpop.f32.mrf.mxu3  ;;  %v3767_v6 = vld [vmem:[#allocation2 + $0x290] sm:$0xf] }
 0x102   :  { %v2388_v14 = vadd.f32 %v2387_v13, %v5182_v5  ;;  %v4894_v5 = vld [vmem:[#allocation4 + $0x448] sm:$0xff]  ;;  %v3764_v13 = vor.u32 %v4738_v61, %v3761_v4 }
 0x103   :  { %v2464_v15 = vpop.f32.mrf.mxu2  ;;  %v2418_v2 = vpop.f32.mrf.mxu0  ;;  %2775 = vmatpush.bf16.msra.mxu1 %v4894_v5  ;;  %v4930_v4 = vld [vmem:[#allocation4 + $0x568] sm:$0xff] }
 0x104   :  { %v5206_v8 = vadd.f32 %v2464_v15, %v2436_v9  ;;  %v5208_v20 = vadd.f32 %v2416_v52, %v2388_v14  ;;  %v4702_v52 = vld [vmem:[#allocation2 + $0x168] sm:$0xf0] }
 0x105   :  { %v2437_v19 = vpop.f32.mrf.mxu1  ;;  %v3576_v11 = vor.u32 %v4702_v52, %v3575_v1  ;;  %v4947_v1 = vld [vmem:[#allocation4 + $0x5f0] sm:$0xff]  ;;  %v4956_v52 = vld [vmem:[#allocation4 + $0x638] sm:$0xff] }
 0x106   :  { %v2438_v21 = vadd.f32 %v2437_v19, %v5190_v32  ;;  %v4919_v19 = vld [vmem:[#allocation4 + $0x510] sm:$0xff] }
 0x107   :  { %2776 = vmatpush.bf16.msra.mxu1 %v4893_v49  ;;  %2861 = vmatpush.bf16.msrb.mxu0 %v4919_v19  ;;  %v4937_v19 = vld [vmem:[#allocation4 + $0x5a0] sm:$0xff] }
 0x109   :  { %v2389_v36 = vpop.f32.mrf.mxu3 }
 0x10a   :  { %v2390_v38 = vadd.f32 %v2389_v36, %v5188_v18  ;;  %v4912_v18 = vld [vmem:[#allocation4 + $0x4d8] sm:$0xff]  ;;  %v3477_v36 = vld [vmem:[#allocation2 + $0xa4] sm:$0xf0] }
 0x10b   :  { %v2466_v32 = vpop.f32.mrf.mxu2  ;;  %v2517_v43 = vpop.f32.mrf.mxu0  ;;  %2831 = vmatpush.bf16.msrb.mxu3 %v4912_v18  ;;  %2862 = vmatpush.bf16.msrb.mxu0 %v4918_v29  ;;  %v3480_v49 = vor.u32 %v4665_v35, %v3477_v36  ;;  %v4946_v29 = vld [vmem:[#allocation4 + $0x5e8] sm:$0xff]  ;;  %v4927_v36 = vld [vmem:[#allocation4 + $0x550] sm:$0xff] }
 0x10c   :  { %v5212_v41 = vadd.f32 %v2466_v32, %v2438_v21  ;;  %v2419_v48 = vadd.f32 %v2418_v2, %v2390_v38  ;;  %v4910_v2 = vld [vmem:[#allocation4 + $0x4c8] sm:$0xff] }
 0x10d   :  { %v2440_v47 = vpop.f32.mrf.mxu1  ;;  %v3483_v38 = vld [vmem:[#allocation2 + $0x48] sm:$0xf]  ;;  %v4678_v32 = vld [vmem:[#allocation2 + $0xa8] sm:$0xf0] }
 0x10e   :  { %v2441_v30 = vadd.f32 %v2440_v47, %v5196_v44  ;;  %2719 = vmatmul.bf16.vlgmr.msra.gmra.mxu3 %v3472_v39  ;;  %2748 = vmatmul.bf16.vlgmr.msra.gmra.mxu0 %v3476_v26  ;;  %v3484_v50 = vor.u32 %v4678_v32, %v3483_v38  ;;  %v4935_v38 = vld [vmem:[#allocation4 + $0x590] sm:$0xff] }
 0x10f   :  { %2832 = vmatpush.bf16.msrb.mxu3 %v4911_v59  ;;  %v4939_v59 = vld [vmem:[#allocation4 + $0x5b0] sm:$0xff] }
 0x110   :  { %2671 = vmatmul.bf16.gmra.mxu1 %v3664_v40  ;;  %2700 = vmatmul.bf16.gmra.mxu2 %v3668_v45  ;;  %v3676_v40 = vor.u32 %v4727_v22, %v3675_v34  ;;  %v4917_v45 = vld [vmem:[#allocation4 + $0x500] sm:$0xff] }
 0x111   :  { %v2488_v37 = vpop.f32.mrf.mxu3  ;;  %2863 = vmatpush.bf16.msrb.mxu0 %v4917_v45  ;;  %v4715_v45 = vld [vmem:[#allocation2 + $0x1d4] sm:$0xf] }
 0x112   :  { %v2489_v54 = vadd.f32 %v2488_v37, %v5194_v42  ;;  %v4751_v42 = vld [vmem:[#allocation2 + $0x2f0] sm:$0xf0]  ;;  %v4940_v37 = vld [vmem:[#allocation4 + $0x5b8] sm:$0xff] }
 0x113   :  { %v2469_v53 = vpop.f32.mrf.mxu2  ;;  %v2519_v56 = vpop.f32.mrf.mxu0  ;;  %v3768_v14 = vor.u32 %v4751_v42, %v3767_v6  ;;  %2833 = vmatpush.bf16.msrb.mxu3 %v4910_v2  ;;  %2914 = vmatpush.bf16.msrb.mxu2 %v4940_v37  ;;  %v4739_v6 = vld [vmem:[#allocation2 + $0x294] sm:$0xf]  ;;  %v3769_v42 = vld [vmem:[#allocation2 + $0x2f4] sm:$0xf0]  ;;  %v4929_v2 = vld [vmem:[#allocation4 + $0x560] sm:$0xff] }
 0x114   :  { %v5216_v55 = vadd.f32 %v2469_v53, %v2441_v30  ;;  %v5218_v58 = vadd.f32 %v2517_v43, %v2489_v54  ;;  %v3672_v43 = vor.u32 %v4714_v31, %v3669_v33  ;;  %v4932_v53 = vld [vmem:[#allocation4 + $0x578] sm:$0xff]  ;;  %v4955_v31 = vld [vmem:[#allocation4 + $0x630] sm:$0xff] }
 0x115   :  { %v2442_v46 = vpop.f32.mrf.mxu1  ;;  %2885 = vmatpush.bf16.msrb.mxu1 %v4932_v53  ;;  %2972 = vmatpush.bf16.msra.mxu0 %v4956_v52  ;;  %v4936_v33 = vld [vmem:[#allocation4 + $0x598] sm:$0xff] }
 0x116   :  { %v2443_v44 = vadd.f32 %v2442_v46, %v5202_v62  ;;  %v3677_v37 = vld [vmem:[#allocation2 + $0x234] sm:$0xf0]  ;;  %v4728_v53 = vld [vmem:[#allocation2 + $0x238] sm:$0xf0] }
 0x117   :  { %2915 = vmatpush.bf16.msrb.mxu2 %v4939_v59 }
 0x119   :  { %v2490_v7 = vpop.f32.mrf.mxu3  ;;  %2973 = vmatpush.bf16.msra.mxu0 %v4955_v31 }
 0x11a   :  { %v2491_v57 = vadd.f32 %v2490_v7, %v5200_v3  ;;  %v4938_v7 = vld [vmem:[#allocation4 + $0x5a8] sm:$0xff] }
 0x11b   :  { %v2471_v9 = vpop.f32.mrf.mxu2  ;;  %v2522_v62 = vpop.f32.mrf.mxu0  ;;  %2916 = vmatpush.bf16.msrb.mxu2 %v4938_v7  ;;  %v4953_v7 = vld [vmem:[#allocation4 + $0x620] sm:$0xff] }
 0x11c   :  { %v5222_v12 = vadd.f32 %v2471_v9, %v2443_v44  ;;  %v5224_v16 = vadd.f32 %v2519_v56, %v2491_v57  ;;  %v4931_v44 = vld [vmem:[#allocation4 + $0x570] sm:$0xff]  ;;  %v4752_v9 = vld [vmem:[#allocation2 + $0x2f8] sm:$0xf0]  ;;  %v4690_v57 = vld [vmem:[#allocation2 + $0x10c] sm:$0xf] }
 0x11d   :  { %v2445_v15 = vpop.f32.mrf.mxu1  ;;  %2886 = vmatpush.bf16.msrb.mxu1 %v4931_v44 }
 0x11e   :  { %v2446_v17 = vadd.f32 %v2445_v15, %v5208_v20  ;;  %2724 = vmatmul.bf16.gmra.mxu3 %v3572_v10  ;;  %2753 = vmatmul.bf16.gmra.mxu0 %v3576_v11  ;;  %v4909_v20 = vld [vmem:[#allocation4 + $0x4c0] sm:$0xff]  ;;  %v3577_v10 = vld [vmem:[#allocation2 + $0x16c] sm:$0xf0] }
 0x11f   :  { %2834 = vmatpush.bf16.msrb.mxu3 %v4909_v20  ;;  %v3583_v11 = vld [vmem:[#allocation2 + $0x110] sm:$0xf]  ;;  %2917 = vmatpush.bf16.msrb.mxu2 %v4937_v19  ;;  %v3591_v19 = vld [vmem:[#allocation2 + $0x118] sm:$0xf] }
 0x120   :  { %2676 = vmatmul.bf16.gmra.mxu1 %v3764_v13  ;;  %2705 = vmatmul.bf16.gmra.mxu2 %v3768_v14 }
 0x121   :  { %v2493_v21 = vpop.f32.mrf.mxu3  ;;  %2887 = vmatpush.bf16.msrb.mxu1 %v4930_v4  ;;  %v4925_v4 = vld [vmem:[#allocation4 + $0x540] sm:$0xff] }
 0x122   :  { %v2494_v23 = vadd.f32 %v2493_v21, %v5206_v8 }
 0x123   :  { %v2474_v3 = vpop.f32.mrf.mxu2  ;;  %v2524_v25 = vpop.f32.mrf.mxu0  ;;  %2918 = vmatpush.bf16.msrb.mxu2 %v4936_v33 }
 0x124   :  { %v5228_v24 = vadd.f32 %v2474_v3, %v2446_v17  ;;  %v5230_v5 = vadd.f32 %v2522_v62, %v2494_v23  ;;  %v4703_v62 = vld [vmem:[#allocation2 + $0x170] sm:$0xf0]  ;;  %v3580_v23 = vor.u32 %v4690_v57, %v3577_v10 }
 0x125   :  { %v2447_v27 = vpop.f32.mrf.mxu1  ;;  %2888 = vmatpush.bf16.msrb.mxu1 %v4929_v2  ;;  %v3585_v2 = vld [vmem:[#allocation2 + $0x174] sm:$0xf0] }
 0x126   :  { %v2448_v28 = vadd.f32 %v2447_v27, %v2419_v48 }
 0x127   :  { %2919 = vmatpush.bf16.msrb.mxu2 %v4935_v38 }
 0x129   :  { %v2495_v8 = vpop.f32.mrf.mxu3 }
 0x12a   :  { %v2496_v26 = vadd.f32 %v2495_v8, %v5212_v41  ;;  %v4948_v41 = vld [vmem:[#allocation4 + $0x5f8] sm:$0xff] }
 0x12b   :  { %v2476_v39 = vpop.f32.mrf.mxu2  ;;  %v2527_v48 = vpop.f32.mrf.mxu0  ;;  %2943 = vmatpush.bf16.msra.mxu3 %v4948_v41  ;;  %v3683_v41 = vld [vmem:[#allocation2 + $0x1d8] sm:$0xf] }
 0x12c   :  { %v5233_v47 = vadd.f32 %v2476_v39, %v2448_v28  ;;  %v5235_v18 = vadd.f32 %v2524_v25, %v2496_v26  ;;  %v3584_v25 = vor.u32 %v4703_v62, %v3583_v11 }
 0x12d   :  { %v2546_v30 = vpop.f32.mrf.mxu1 }
 0x12e   :  { %v2547_v51 = vadd.f32 %v2546_v30, %v5218_v58  ;;  %2729 = vmatmul.bf16.gmra.mxu3 %v3672_v43  ;;  %2758 = vmatmul.bf16.gmra.mxu0 %v3676_v40  ;;  %v4945_v43 = vld [vmem:[#allocation4 + $0x5e0] sm:$0xff]  ;;  %v4954_v40 = vld [vmem:[#allocation4 + $0x628] sm:$0xff]  ;;  %v3491_v30 = vld [vmem:[#allocation2 + $0x50] sm:$0xf] }
 0x12f   :  { %2944 = vmatpush.bf16.msra.mxu3 %v4947_v1  ;;  %2974 = vmatpush.bf16.msra.mxu0 %v4954_v40 }
 0x130   :  { %2777 = vmatmul.bf16.vlgmr.msra.gmra.mxu1 %v3480_v49  ;;  %2806 = vmatmul.bf16.vlgmr.msra.gmra.mxu2 %v3484_v50  ;;  %v4934_v49 = vld [vmem:[#allocation4 + $0x588] sm:$0xff]  ;;  %v3485_v50 = vld [vmem:[#allocation2 + $0xac] sm:$0xf0] }
 0x131   :  { %v2498_v54 = vpop.f32.mrf.mxu3  ;;  %2920 = vmatpush.bf16.msrb.mxu2 %v4934_v49 }
 0x132   :  { %v2499_v56 = vadd.f32 %v2498_v54, %v5216_v55  ;;  %v3775_v55 = vld [vmem:[#allocation2 + $0x298] sm:$0xf] }
 0x133   :  { %v2575_v46 = vpop.f32.mrf.mxu2  ;;  %v2529_v61 = vpop.f32.mrf.mxu0  ;;  %v3776_v17 = vor.u32 %v4752_v9, %v3775_v55  ;;  %2945 = vmatpush.bf16.msra.mxu3 %v4946_v29  ;;  %2975 = vmatpush.bf16.msra.mxu0 %v4953_v7 }
 0x134   :  { %v5239_v60 = vadd.f32 %v2575_v46, %v2547_v51  ;;  %v5241_v63 = vadd.f32 %v2527_v48, %v2499_v56  ;;  %v4666_v48 = vld [vmem:[#allocation2 + $0x4c] sm:$0xf]  ;;  %v4679_v51 = vld [vmem:[#allocation2 + $0xb0] sm:$0xf0] }
 0x135   :  { %v2548_v58 = vpop.f32.mrf.mxu1  ;;  %v3488_v46 = vor.u32 %v4666_v48, %v3485_v50  ;;  %v3492_v44 = vor.u32 %v4679_v51, %v3491_v30  ;;  %v4941_v50 = vld [vmem:[#allocation4 + $0x5c0] sm:$0xff]  ;;  %v4716_v30 = vld [vmem:[#allocation2 + $0x1dc] sm:$0xf] }
 0x136   :  { %v2549_v0 = vadd.f32 %v2548_v58, %v5224_v16  ;;  %v3772_v16 = vor.u32 %v4739_v6, %v3769_v42  ;;  %v3680_v58 = vor.u32 %v4715_v45, %v3677_v37  ;;  %v4933_v6 = vld [vmem:[#allocation4 + $0x580] sm:$0xff] }
 0x137   :  { %2946 = vmatpush.bf16.msra.mxu3 %v4945_v43  ;;  %2921 = vmatpush.bf16.msrb.mxu2 %v4933_v6  ;;  %v3685_v51 = vld [vmem:[#allocation2 + $0x23c] sm:$0xf0] }
 0x138   :  { %v3691_v37 = vld [vmem:[#allocation2 + $0x1e0] sm:$0xf] }
 0x139   :  { %v2500_v13 = vpop.f32.mrf.mxu3 }
 0x13a   :  { %v2501_v14 = vadd.f32 %v2500_v13, %v5222_v12  ;;  %v4928_v12 = vld [vmem:[#allocation4 + $0x558] sm:$0xff] }
 0x13b   :  { %v2577_v15 = vpop.f32.mrf.mxu2  ;;  %v2532_v3 = vpop.f32.mrf.mxu0  ;;  %2889 = vmatpush.bf16.msrb.mxu1 %v4928_v12 }
 0x13c   :  { %v5245_v21 = vadd.f32 %v2577_v15, %v2549_v0  ;;  %v5247_v28 = vadd.f32 %v2529_v61, %v2501_v14  ;;  %v3684_v0 = vor.u32 %v4728_v53, %v3683_v41  ;;  %v4943_v14 = vld [vmem:[#allocation4 + $0x5d0] sm:$0xff]  ;;  %v4952_v15 = vld [vmem:[#allocation4 + $0x618] sm:$0xff]  ;;  %v4729_v41 = vld [vmem:[#allocation2 + $0x240] sm:$0xf0] }
 0x13d   :  { %v2551_v27 = vpop.f32.mrf.mxu1  ;;  %2976 = vmatpush.bf16.msra.mxu0 %v4952_v15  ;;  %v4667_v53 = vld [vmem:[#allocation2 + $0x54] sm:$0xf]  ;;  %v3785_v15 = vld [vmem:[#allocation2 + $0x304] sm:$0xf0] }
 0x13e   :  { %v2552_v20 = vadd.f32 %v2551_v27, %v5230_v5  ;;  %2734 = vmatmul.bf16.gmra.mxu3 %v3772_v16  ;;  %2763 = vmatmul.bf16.gmra.mxu0 %v3776_v17  ;;  %v4740_v16 = vld [vmem:[#allocation2 + $0x29c] sm:$0xf]  ;;  %v4691_v17 = vld [vmem:[#allocation2 + $0x114] sm:$0xf] }
 0x13f   :  { %2890 = vmatpush.bf16.msrb.mxu1 %v4927_v36  ;;  %v3588_v29 = vor.u32 %v4691_v17, %v3585_v2  ;;  %v4754_v17 = vld [vmem:[#allocation2 + $0x308] sm:$0xf0]  ;;  %v4692_v2 = vld [vmem:[#allocation2 + $0x11c] sm:$0xf] }
 0x140   :  { %2782 = vmatmul.bf16.gmra.mxu1 %v3580_v23  ;;  %2811 = vmatmul.bf16.gmra.mxu2 %v3584_v25  ;;  %v3777_v23 = vld [vmem:[#allocation2 + $0x2fc] sm:$0xf0] }
 0x141   :  { %v2503_v34 = vpop.f32.mrf.mxu3  ;;  %v3783_v25 = vld [vmem:[#allocation2 + $0x2a0] sm:$0xf] }
 0x142   :  { %v2504_v22 = vadd.f32 %v2503_v34, %v5228_v24  ;;  %v4926_v24 = vld [vmem:[#allocation4 + $0x548] sm:$0xff]  ;;  %v3780_v34 = vor.u32 %v4740_v16, %v3777_v23 }
 0x143   :  { %v2580_v35 = vpop.f32.mrf.mxu2  ;;  %v2534_v32 = vpop.f32.mrf.mxu0  ;;  %2891 = vmatpush.bf16.msrb.mxu1 %v4926_v24  ;;  %v3791_v16 = vld [vmem:[#allocation2 + $0x2a8] sm:$0xf] }
 0x144   :  { %v5251_v5 = vadd.f32 %v2580_v35, %v2552_v20  ;;  %v5253_v39 = vadd.f32 %v2532_v3, %v2504_v22  ;;  %v4704_v3 = vld [vmem:[#allocation2 + $0x178] sm:$0xf0] }
 0x145   :  { %v2553_v8 = vpop.f32.mrf.mxu1  ;;  %v3592_v31 = vor.u32 %v4704_v3, %v3591_v19  ;;  %v3593_v19 = vld [vmem:[#allocation2 + $0x17c] sm:$0xf0]  ;;  %v4705_v3 = vld [vmem:[#allocation2 + $0x180] sm:$0xf0] }
 0x146   :  { %v2554_v26 = vadd.f32 %v2553_v8, %v5235_v18  ;;  %v4951_v8 = vld [vmem:[#allocation4 + $0x610] sm:$0xff] }
 0x147   :  { %2892 = vmatpush.bf16.msrb.mxu1 %v4925_v4  ;;  %2977 = vmatpush.bf16.msra.mxu0 %v4951_v8 }
 0x149   :  { %v2505_v54 = vpop.f32.mrf.mxu3 }
 0x14a   :  { %v2506_v56 = vadd.f32 %v2505_v54, %v5233_v47  ;;  %v4944_v47 = vld [vmem:[#allocation4 + $0x5d8] sm:$0xff] }
 0x14b   :  { %v2582_v18 = vpop.f32.mrf.mxu2  ;;  %v2633_v61 = vpop.f32.mrf.mxu0  ;;  %2947 = vmatpush.bf16.msra.mxu3 %v4944_v47  ;;  %v3493_v54 = vld [vmem:[#allocation2 + $0xb4] sm:$0xf0] }
 0x14c   :  { %v5257_v59 = vadd.f32 %v2582_v18, %v2554_v26  ;;  %v2535_v52 = vadd.f32 %v2534_v32, %v2506_v56  ;;  %v4942_v32 = vld [vmem:[#allocation4 + $0x5c8] sm:$0xff]  ;;  %v3499_v56 = vld [vmem:[#allocation2 + $0x58] sm:$0xf]  ;;  %v4680_v18 = vld [vmem:[#allocation2 + $0xb8] sm:$0xf0]  ;;  %v3496_v4 = vor.u32 %v4667_v53, %v3493_v54 }
 0x14d   :  { %v2556_v1 = vpop.f32.mrf.mxu1  ;;  %v3500_v6 = vor.u32 %v4680_v18, %v3499_v56 }
 0x14e   :  { %v2557_v42 = vadd.f32 %v2556_v1, %v5241_v63  ;;  %2835 = vmatmul.bf16.vlgmr.msrb.gmra.mxu3 %v3488_v46  ;;  %2864 = vmatmul.bf16.vlgmr.msrb.gmra.mxu0 %v3492_v44 }
 0x14f   :  { %2948 = vmatpush.bf16.msra.mxu3 %v4943_v14  ;;  %v4741_v14 = vld [vmem:[#allocation2 + $0x2a4] sm:$0xf] }
 0x150   :  { %2787 = vmatmul.bf16.gmra.mxu1 %v3680_v58  ;;  %2816 = vmatmul.bf16.gmra.mxu2 %v3684_v0  ;;  %v3692_v58 = vor.u32 %v4729_v41, %v3691_v37  ;;  %v4949_v0 = vld [vmem:[#allocation4 + $0x600] sm:$0xff] }
 0x151   :  { %v2604_v55 = vpop.f32.mrf.mxu3 }
 0x152   :  { %v2605_v57 = vadd.f32 %v2604_v55, %v5239_v60  ;;  %v4753_v60 = vld [vmem:[#allocation2 + $0x300] sm:$0xf0] }
 0x153   :  { %v2585_v9 = vpop.f32.mrf.mxu2  ;;  %v2635_v11 = vpop.f32.mrf.mxu0  ;;  %v3784_v22 = vor.u32 %v4753_v60, %v3783_v25  ;;  %2949 = vmatpush.bf16.msra.mxu3 %v4942_v32 }
 0x154   :  { %v5261_v10 = vadd.f32 %v2585_v9, %v2557_v42  ;;  %v5263_v13 = vadd.f32 %v2633_v61, %v2605_v57  ;;  %v3688_v61 = vor.u32 %v4716_v30, %v3685_v51 }
 0x155   :  { %v2558_v62 = vpop.f32.mrf.mxu1 }
 0x156   :  { %v2559_v63 = vadd.f32 %v2558_v62, %v5247_v28 }
 0x157   :  { %2950 = vmatpush.bf16.msra.mxu3 %v4941_v50  ;;  %v3693_v50 = vld [vmem:[#allocation2 + $0x244] sm:$0xf0] }
 0x159   :  { %v2606_v27 = vpop.f32.mrf.mxu3 }
 0x15a   :  { %v2607_v12 = vadd.f32 %v2606_v27, %v5245_v21  ;;  %v3792_v27 = vor.u32 %v4754_v17, %v3791_v16 }
 0x15b   :  { %v2587_v20 = vpop.f32.mrf.mxu2  ;;  %v2638_v28 = vpop.f32.mrf.mxu0 }
 0x15c   :  { %v5267_v33 = vadd.f32 %v2587_v20, %v2559_v63  ;;  %v5269_v36 = vadd.f32 %v2635_v11, %v2607_v12  ;;  %v3596_v12 = vor.u32 %v4692_v2, %v3593_v19 }
 0x15d   :  { %v2561_v35 = vpop.f32.mrf.mxu1 }
 0x15e   :  { %v2562_v38 = vadd.f32 %v2561_v35, %v5253_v39  ;;  %2840 = vmatmul.bf16.gmra.mxu3 %v3588_v29  ;;  %2869 = vmatmul.bf16.gmra.mxu0 %v3592_v31  ;;  %v4950_v39 = vld [vmem:[#allocation4 + $0x608] sm:$0xff] }
 0x15f   :  { %2978 = vmatpush.bf16.msra.mxu0 %v4950_v39  ;;  %v3699_v39 = vld [vmem:[#allocation2 + $0x1e8] sm:$0xf] }
 0x160   :  { %2792 = vmatmul.bf16.gmra.mxu1 %v3780_v34  ;;  %2821 = vmatmul.bf16.gmra.mxu2 %v3784_v22 }
 0x161   :  { %v2609_v26 = vpop.f32.mrf.mxu3 }
 0x162   :  { %v2610_v43 = vadd.f32 %v2609_v26, %v5251_v5 }
 0x163   :  { %v2590_v21 = vpop.f32.mrf.mxu2  ;;  %v2640_v45 = vpop.f32.mrf.mxu0  ;;  %2979 = vmatpush.bf16.msra.mxu0 %v4949_v0 }
 0x164   :  { %v5273_v40 = vadd.f32 %v2590_v21, %v2562_v38  ;;  %v2639_v24 = vadd.f32 %v2638_v28, %v2610_v43  ;;  %v4717_v21 = vld [vmem:[#allocation2 + $0x1e4] sm:$0xf]  ;;  %v4668_v43 = vld [vmem:[#allocation2 + $0x5c] sm:$0xf] }
 0x165   :  { %v2563_v48 = vpop.f32.mrf.mxu1 }
 0x166   :  { %v2564_v49 = vadd.f32 %v2563_v48, %v2535_v52  ;;  %v3507_v48 = vld [vmem:[#allocation2 + $0x60] sm:$0xf] }
 0x169   :  { %v2611_v46 = vpop.f32.mrf.mxu3 }
 0x16a   :  { %v2612_v44 = vadd.f32 %v2611_v46, %v5257_v59 }
 0x16b   :  { %v2592_v5 = vpop.f32.mrf.mxu2  ;;  %v2643_v52 = vpop.f32.mrf.mxu0 }
 0x16c   :  { %v2593_v1 = vadd.f32 %v2592_v5, %v2564_v49  ;;  %v5276_v47 = vadd.f32 %v2640_v45, %v2612_v44  ;;  %v3501_v45 = vld [vmem:[#allocation2 + $0xbc] sm:$0xf0]  ;;  %v4681_v49 = vld [vmem:[#allocation2 + $0xc0] sm:$0xf0] }
 0x16d   :  { %v2662_v42 = vpop.f32.mrf.mxu1  ;;  %v3504_v41 = vor.u32 %v4668_v43, %v3501_v45  ;;  %v3508_v53 = vor.u32 %v4681_v49, %v3507_v48 }
 0x16e   :  { %v2663_v7 = vadd.f32 %v2662_v42, %v5263_v13  ;;  %2845 = vmatmul.bf16.gmra.mxu3 %v3688_v61  ;;  %2874 = vmatmul.bf16.gmra.mxu0 %v3692_v58  ;;  %v3599_v13 = vld [vmem:[#allocation2 + $0x120] sm:$0xf]  ;;  %v4693_v42 = vld [vmem:[#allocation2 + $0x124] sm:$0xf] }
 0x16f   :  { %v3600_v29 = vor.u32 %v4705_v3, %v3599_v13 }
 0x170   :  { %2893 = vmatmul.bf16.vlgmr.msrb.gmra.mxu1 %v3496_v4  ;;  %2922 = vmatmul.bf16.vlgmr.msrb.gmra.mxu2 %v3500_v6  ;;  %v4742_v6 = vld [vmem:[#allocation2 + $0x2ac] sm:$0xf] }
 0x171   :  { %v2614_v55 = vpop.f32.mrf.mxu3 }
 0x172   :  { %v2615_v59 = vadd.f32 %v2614_v55, %v5261_v10  ;;  %v3788_v10 = vor.u32 %v4741_v14, %v3785_v15  ;;  %v3607_v55 = vld [vmem:[#allocation2 + $0x128] sm:$0xf] }
 0x173   :  { %v2691_v9 = vpop.f32.mrf.mxu2  ;;  %v2645_v11 = vpop.f32.mrf.mxu0 }
 0x174   :  { %v2692_v57 = vadd.f32 %v2691_v9, %v2663_v7  ;;  %v2644_v63 = vadd.f32 %v2643_v52, %v2615_v59  ;;  %v3601_v7 = vld [vmem:[#allocation2 + $0x184] sm:$0xf0]  ;;  %v4706_v59 = vld [vmem:[#allocation2 + $0x188] sm:$0xf0]  ;;  %v3793_v9 = vld [vmem:[#allocation2 + $0x30c] sm:$0xf0] }
 0x175   :  { %v5280_v62 = vpop.f32.mrf.mxu1  ;;  %v3604_v16 = vor.u32 %v4693_v42, %v3601_v7  ;;  %v3608_v17 = vor.u32 %v4706_v59, %v3607_v55  ;;  %v3796_v2 = vor.u32 %v4742_v6, %v3793_v9 }
 0x179   :  { %v2616_v23 = vpop.f32.mrf.mxu3 }
 0x17a   :  { %v2617_v25 = vadd.f32 %v2616_v23, %v5267_v33 }
 0x17b   :  { %v5283_v60 = vpop.f32.mrf.mxu2  ;;  %v2648_v20 = vpop.f32.mrf.mxu0 }
 0x17c   :  { %v5285_v28 = vadd.f32 %v2645_v11, %v2617_v25  ;;  %v3799_v11 = vld [vmem:[#allocation2 + $0x2b0] sm:$0xf] }
 0x17d   :  { %v2667_v31 = vpop.f32.mrf.mxu1 }
 0x17e   :  { %v2668_v34 = vadd.f32 %v2667_v31, %v2639_v24  ;;  %2850 = vmatmul.bf16.gmra.mxu3 %v3788_v10  ;;  %2879 = vmatmul.bf16.gmra.mxu0 %v3792_v27  ;;  %v4730_v24 = vld [vmem:[#allocation2 + $0x248] sm:$0xf0] }
 0x17f   :  { %v3700_v56 = vor.u32 %v4730_v24, %v3699_v39 }
 0x180   :  { %2898 = vmatmul.bf16.gmra.mxu1 %v3596_v12  ;;  %2927 = vmatmul.bf16.gmra.mxu2 %v3600_v29 }
 0x181   :  { %v2619_v22 = vpop.f32.mrf.mxu3 }
 0x182   :  { %v2620_v35 = vadd.f32 %v2619_v22, %v5273_v40  ;;  %v3696_v40 = vor.u32 %v4717_v21, %v3693_v50  ;;  %v4718_v22 = vld [vmem:[#allocation2 + $0x1ec] sm:$0xf] }
 0x183   :  { %v2696_v38 = vpop.f32.mrf.mxu2  ;;  %v2650_v32 = vpop.f32.mrf.mxu0 }
 0x184   :  { %v2697_v33 = vadd.f32 %v2696_v38, %v2668_v34  ;;  %v2649_v26 = vadd.f32 %v2648_v20, %v2620_v35  ;;  %v3701_v35 = vld [vmem:[#allocation2 + $0x24c] sm:$0xf0] }
 0x185   :  { %v2669_v8 = vpop.f32.mrf.mxu1  ;;  %v3707_v38 = vld [vmem:[#allocation2 + $0x1f0] sm:$0xf]  ;;  %v3704_v48 = vor.u32 %v4718_v22, %v3701_v35 }
 0x186   :  { %v2670_v34 = vadd.f32 %v2669_v8, %v5276_v47 }
 0x189   :  { %v2621_v30 = vpop.f32.mrf.mxu3 }
 0x18a   :  { %v2622_v51 = vadd.f32 %v2621_v30, %v2593_v1 }
 0x18b   :  { %v2698_v37 = vpop.f32.mrf.mxu2  ;;  %v2749_v54 = vpop.f32.mrf.mxu0 }
 0x18c   :  { %v2651_v46 = vadd.f32 %v2650_v32, %v2622_v51  ;;  %v4731_v32 = vld [vmem:[#allocation2 + $0x250] sm:$0xf0] }
 0x18d   :  { %v2672_v18 = vpop.f32.mrf.mxu1  ;;  %v3708_v49 = vor.u32 %v4731_v32, %v3707_v38 }
 0x18e   :  { %v2673_v5 = vadd.f32 %v2672_v18, %v2644_v63  ;;  %2951 = vmatmul.bf16.vlgmr.msra.gmra.mxu3 %v3504_v41  ;;  %2980 = vmatmul.bf16.vlgmr.msra.gmra.mxu0 %v3508_v53  ;;  %v4755_v63 = vld [vmem:[#allocation2 + $0x310] sm:$0xf0]  ;;  %v4756_v18 = vld [vmem:[#allocation2 + $0x318] sm:$0xf0] }
 0x18f   :  { %v3800_v19 = vor.u32 %v4755_v63, %v3799_v11  ;;  %v4743_v53 = vld [vmem:[#allocation2 + $0x2b4] sm:$0xf] }
 0x190   :  { %2903 = vmatmul.bf16.gmra.mxu1 %v3696_v40  ;;  %2932 = vmatmul.bf16.gmra.mxu2 %v3700_v56  ;;  %v3801_v40 = vld [vmem:[#allocation2 + $0x314] sm:$0xf0] }
 0x191   :  { %v2720_v44 = vpop.f32.mrf.mxu3  ;;  %v3807_v56 = vld [vmem:[#allocation2 + $0x2b8] sm:$0xf] }
 0x192   :  { %v2721_v58 = vadd.f32 %v2720_v44, %v2692_v57  ;;  %v3808_v6 = vor.u32 %v4756_v18, %v3807_v56 }
 0x193   :  { %v2701_v61 = vpop.f32.mrf.mxu2  ;;  %v5288_v52 = vpop.f32.mrf.mxu0 }
 0x194   :  { %v2702_v0 = vadd.f32 %v2701_v61, %v2673_v5  ;;  %v5290_v4 = vadd.f32 %v2749_v54, %v2721_v58  ;;  %v3804_v58 = vor.u32 %v4743_v53, %v3801_v40 }
 0x195   :  { %v2674_v1 = vpop.f32.mrf.mxu1 }
 0x199   :  { %v5292_v14 = vpop.f32.mrf.mxu3 }
 0x19b   :  { %v2703_v15 = vpop.f32.mrf.mxu2  ;;  %v2754_v57 = vpop.f32.mrf.mxu0 }
 0x19d   :  { %v2677_v13 = vpop.f32.mrf.mxu1 }
 0x19e   :  { %v2678_v3 = vadd.f32 %v2677_v13, %v2649_v26  ;;  %2956 = vmatmul.bf16.gmra.mxu3 %v3604_v16  ;;  %2985 = vmatmul.bf16.gmra.mxu0 %v3608_v17  ;;  %v2699_v26 = vadd.f32 %v2698_v37, %v2670_v34  ;;  %v2675_v37 = vadd.f32 %v2674_v1, %v5285_v28 }
 0x1a0   :  { %2908 = vmatmul.bf16.gmra.mxu1 %v3796_v2  ;;  %2937 = vmatmul.bf16.gmra.mxu2 %v3800_v19 }
 0x1a1   :  { %v2725_v23 = vpop.f32.mrf.mxu3 }
 0x1a2   :  { %v2726_v10 = vadd.f32 %v2725_v23, %v2697_v33 }
 0x1a3   :  { %v2706_v25 = vpop.f32.mrf.mxu2  ;;  %v2756_v20 = vpop.f32.mrf.mxu0 }
 0x1a4   :  { %v2707_v27 = vadd.f32 %v2706_v25, %v2678_v3  ;;  %v5294_v29 = vadd.f32 %v2754_v57, %v2726_v10 }
 0x1a5   :  { %v2679_v12 = vpop.f32.mrf.mxu1 }
 0x1a6   :  { %v2680_v31 = vadd.f32 %v2679_v12, %v2651_v46  ;;  %v2704_v46 = vadd.f32 %v2703_v15, %v2675_v37 }
 0x1a9   :  { %v2727_v21 = vpop.f32.mrf.mxu3 }
 0x1aa   :  { %v2728_v45 = vadd.f32 %v2727_v21, %v2699_v26 }
 0x1ab   :  { %v2708_v43 = vpop.f32.mrf.mxu2  ;;  %v2759_v33 = vpop.f32.mrf.mxu0 }
 0x1ac   :  { %v2709_v50 = vadd.f32 %v2708_v43, %v2680_v31  ;;  %v5297_v39 = vadd.f32 %v2756_v20, %v2728_v45 }
 0x1ad   :  { %v2778_v24 = vpop.f32.mrf.mxu1 }
 0x1ae   :  { %2961 = vmatmul.bf16.gmra.mxu3 %v3704_v48  ;;  %2990 = vmatmul.bf16.gmra.mxu0 %v3708_v49 }
 0x1b1   :  { %v2730_v30 = vpop.f32.mrf.mxu3 }
 0x1b2   :  { %v2731_v51 = vadd.f32 %v2730_v30, %v2702_v0 }
 0x1b3   :  { %v2807_v47 = vpop.f32.mrf.mxu2  ;;  %v2761_v8 = vpop.f32.mrf.mxu0 }
 0x1b4   :  { %v5299_v41 = vadd.f32 %v2759_v33, %v2731_v51  ;;  %v2665_v33 = vadd.f32 %v5280_v62, %v5269_v36 }
 0x1b5   :  { %v2780_v54 = vpop.f32.mrf.mxu1 }
 0x1b6   :  { %v2694_v51 = vadd.f32 %v5283_v60, %v2665_v33 }
 0x1b8   :  { %v2723_v37 = vadd.f32 %v5292_v14, %v2694_v51 }
 0x1b9   :  { %v2732_v5 = vpop.f32.mrf.mxu3 }
 0x1ba   :  { %v2733_v44 = vadd.f32 %v2732_v5, %v2704_v46  ;;  %v2752_v5 = vadd.f32 %v5288_v52, %v2723_v37 }
 0x1bb   :  { %v2809_v61 = vpop.f32.mrf.mxu2  ;;  %v2764_v42 = vpop.f32.mrf.mxu0 }
 0x1bc   :  { %v5302_v7 = vadd.f32 %v2761_v8, %v2733_v44  ;;  %v2779_v8 = vadd.f32 %v2778_v24, %v5290_v4 }
 0x1bd   :  { %v2783_v0 = vpop.f32.mrf.mxu1 }
 0x1be   :  { %2966 = vmatmul.bf16.gmra.mxu3 %v3804_v58  ;;  %2995 = vmatmul.bf16.gmra.mxu0 %v3808_v6  ;;  %v2808_v53 = vadd.f32 %v2807_v47, %v2779_v8  ;;  %v2781_v58 = vadd.f32 %v2780_v54, %v2752_v5  ;;  %v2784_v47 = vadd.f32 %v2783_v0, %v5294_v29 }
 0x1c0   :  { %v2810_v36 = vadd.f32 %v2809_v61, %v2781_v58 }
 0x1c1   :  { %v2735_v55 = vpop.f32.mrf.mxu3 }
 0x1c2   :  { %v2736_v59 = vadd.f32 %v2735_v55, %v2707_v27 }
 0x1c3   :  { %v2812_v28 = vpop.f32.mrf.mxu2  ;;  %v2766_v1 = vpop.f32.mrf.mxu0 }
 0x1c4   :  { %v5304_v9 = vadd.f32 %v2764_v42, %v2736_v59 }
 0x1c5   :  { %v2785_v15 = vpop.f32.mrf.mxu1 }
 0x1c9   :  { %v2737_v11 = vpop.f32.mrf.mxu3 }
 0x1ca   :  { %v2738_v63 = vadd.f32 %v2737_v11, %v2709_v50 }
 0x1cb   :  { %v2865_v16 = vpop.f32.mrf.mxu0  ;;  %v5308_v57 = vpop.f32.mrf.mxu2 }
 0x1cc   :  { %v5306_v17 = vadd.f32 %v2766_v1, %v2738_v63  ;;  %v2813_v63 = vadd.f32 %v2812_v28, %v2784_v47 }
 0x1cd   :  { %v5310_v13 = vpop.f32.mrf.mxu1 }
 0x1d1   :  { %v2836_v2 = vpop.f32.mrf.mxu3 }
 0x1d2   :  { %v2837_v56 = vadd.f32 %v2836_v2, %v2808_v53 }
 0x1d3   :  { %v2867_v19 = vpop.f32.mrf.mxu0  ;;  %v5312_v3 = vpop.f32.mrf.mxu2 }
 0x1d4   :  { %v2866_v6 = vadd.f32 %v2865_v16, %v2837_v56 }
 0x1d5   :  { %v5314_v10 = vpop.f32.mrf.mxu1 }
 0x1d9   :  { %v2838_v23 = vpop.f32.mrf.mxu3 }
 0x1da   :  { %v2839_v42 = vadd.f32 %v2838_v23, %v2810_v36 }
 0x1db   :  { %v2870_v25 = vpop.f32.mrf.mxu0  ;;  %v5316_v27 = vpop.f32.mrf.mxu2 }
 0x1dc   :  { %v2868_v1 = vadd.f32 %v2867_v19, %v2839_v42 }
 0x1dd   :  { %v5318_v31 = vpop.f32.mrf.mxu1 }
 0x1e1   :  { %v2841_v20 = vpop.f32.mrf.mxu3 }
 0x1e2   :  { %v2842_v52 = vadd.f32 %v2841_v20, %v2813_v63 }
 0x1e3   :  { %v2872_v12 = vpop.f32.mrf.mxu0  ;;  %v5320_v22 = vpop.f32.mrf.mxu2 }
 0x1e4   :  { %v2871_v33 = vadd.f32 %v2870_v25, %v2842_v52 }
 0x1e5   :  { %v5326_v32 = vpop.f32.mrf.mxu1 }
 0x1e6   :  { %v2796_v52 = vadd.f32 %v5326_v32, %v5306_v17 }
 0x1e9   :  { %v2843_v34 = vpop.f32.mrf.mxu3 }
 0x1eb   :  { %v5322_v35 = vpop.f32.mrf.mxu0  ;;  %v5330_v21 = vpop.f32.mrf.mxu2 }
 0x1ed   :  { %v2894_v48 = vpop.f32.mrf.mxu1 }
 0x1ee   :  { %v2895_v62 = vadd.f32 %v2894_v48, %v2866_v6  ;;  %v2791_v6 = vadd.f32 %v5314_v10, %v5302_v7 }
 0x1f1   :  { %v5324_v38 = vpop.f32.mrf.mxu3 }
 0x1f3   :  { %v5328_v26 = vpop.f32.mrf.mxu0  ;;  %v2923_v49 = vpop.f32.mrf.mxu2 }
 0x1f4   :  { %v2924_v55 = vadd.f32 %v2923_v49, %v2895_v62  ;;  %v2786_v49 = vadd.f32 %v2785_v15, %v5297_v39  ;;  %v4960_v62 = vld [vmem:[#allocation6 + $0x18] sm:$0xff] }
 0x1f5   :  { %v2896_v40 = vpop.f32.mrf.mxu1  ;;  %3120 = vmatpush.bf16.msrb.mxu0 %v4960_v62  ;;  %4971 = vmatpush.bf16.msra.mxu1 %v4960_v62 }
 0x1f6   :  { %v2897_v2 = vadd.f32 %v2896_v40, %v2868_v1  ;;  %v2815_v0 = vadd.f32 %v5308_v57, %v2786_v49  ;;  %v2789_v40 = vadd.f32 %v5310_v13, %v5299_v41 }
 0x1f8   :  { %v2844_v28 = vadd.f32 %v2843_v34, %v2815_v0  ;;  %v2818_v25 = vadd.f32 %v5312_v3, %v2789_v40  ;;  %v2820_v3 = vadd.f32 %v5316_v27, %v2791_v6 }
 0x1f9   :  { %v5332_v43 = vpop.f32.mrf.mxu3 }
 0x1fa   :  { %v2873_v56 = vadd.f32 %v2872_v12, %v2844_v28  ;;  %v2847_v34 = vadd.f32 %v5324_v38, %v2818_v25  ;;  %v2849_v38 = vadd.f32 %v5332_v43, %v2820_v3 }
 0x1fb   :  { %v5334_v45 = vpop.f32.mrf.mxu0  ;;  %v2925_v18 = vpop.f32.mrf.mxu2 }
 0x1fc   :  { %v2926_v54 = vadd.f32 %v2925_v18, %v2897_v2  ;;  %v2876_v41 = vadd.f32 %v5322_v35, %v2847_v34  ;;  %v2878_v27 = vadd.f32 %v5328_v26, %v2849_v38 }
 0x1fd   :  { %v2899_v60 = vpop.f32.mrf.mxu1 }
 0x1fe   :  { %v2900_v19 = vadd.f32 %v2899_v60, %v2871_v33  ;;  %v4959_v60 = vld [vmem:[#allocation6 + $0x10] sm:$0xff] }
 0x1ff   :  { %3121 = vmatpush.bf16.msrb.mxu0 %v4959_v60  ;;  %4972 = vmatpush.bf16.msra.mxu1 %v4959_v60 }
 0x201   :  { %v5336_v50 = vpop.f32.mrf.mxu3 }
 0x203   :  { %v5340_v30 = vpop.f32.mrf.mxu0  ;;  %v2928_v24 = vpop.f32.mrf.mxu2 }
 0x204   :  { %v2929_v8 = vadd.f32 %v2928_v24, %v2900_v19  ;;  %v4958_v24 = vld [vmem:[#allocation6 + $0x8] sm:$0xff] }
 0x205   :  { %v2901_v23 = vpop.f32.mrf.mxu1  ;;  %3122 = vmatpush.bf16.msrb.mxu0 %v4958_v24  ;;  %4973 = vmatpush.bf16.msra.mxu1 %v4958_v24 }
 0x206   :  { %v2902_v18 = vadd.f32 %v2901_v23, %v2873_v56  ;;  %v5105_v56 = vmov 0.0  }
 0x209   :  { %v5345_v46 = vpop.f32.mrf.mxu3 }
 0x20b   :  { %v2981_v44 = vpop.f32.mrf.mxu0  ;;  %v2930_v29 = vpop.f32.mrf.mxu2 }
 0x20c   :  { %v2931_v5 = vadd.f32 %v2930_v29, %v2902_v18 }
 0x20d   :  { %v2904_v15 = vpop.f32.mrf.mxu1 }
 0x20e   :  { %v2905_v36 = vadd.f32 %v2904_v15, %v2876_v41 }
 0x211   :  { %v2952_v59 = vpop.f32.mrf.mxu3 }
 0x212   :  { %v2953_v4 = vadd.f32 %v2952_v59, %v2924_v55  ;;  %v2794_v59 = vadd.f32 %v5318_v31, %v5304_v9 }
 0x213   :  { %v2983_v14 = vpop.f32.mrf.mxu0  ;;  %v2933_v57 = vpop.f32.mrf.mxu2 }
 0x214   :  { %v5349_v11 = vadd.f32 %v2981_v44, %v2953_v4  ;;  %v2934_v55 = vadd.f32 %v2933_v57, %v2905_v36 }
 0x215   :  { %v2906_v42 = vpop.f32.mrf.mxu1 }
 0x216   :  { %3009 = vrot.lane.b32.xlu0 %v5349_v11, %s5099_s26  ;;  %v2907_v43 = vadd.f32 %v2906_v42, %v2878_v27 }
 0x219   :  { %v2954_v61 = vpop.f32.mrf.mxu3 }
 0x21a   :  { %v2955_v16 = vadd.f32 %v2954_v61, %v2926_v54  ;;  %v2825_v61 = vadd.f32 %v5330_v21, %v2796_v52 }
 0x21b   :  { %v2986_v48 = vpop.f32.mrf.mxu0  ;;  %v2935_v7 = vpop.f32.mrf.mxu2 }
 0x21c   :  { %v5354_v51 = vadd.f32 %v2983_v14, %v2955_v16  ;;  %v2823_v14 = vadd.f32 %v5320_v22, %v2794_v59  ;;  %v2936_v63 = vadd.f32 %v2935_v7, %v2907_v43 }
 0x21d   :  { %v2909_v9 = vpop.f32.mrf.mxu1 }
 0x21e   :  { %3011 = vrot.lane.b32.xlu0 %v5354_v51, %s5099_s26  ;;  %v2852_v1 = vadd.f32 %v5336_v50, %v2823_v14  ;;  %v2854_v50 = vadd.f32 %v5345_v46, %v2825_v61  ;;  %v4957_v46 = vld [vmem:[#allocation6] sm:$0xff] }
 0x21f   :  { %3123 = vmatpush.bf16.msrb.mxu0 %v4957_v46  ;;  %4974 = vmatpush.bf16.msra.mxu1 %v4957_v46 }
 0x220   :  { %v2881_v54 = vadd.f32 %v5334_v45, %v2852_v1  ;;  %v2883_v0 = vadd.f32 %v5340_v30, %v2854_v50 }
 0x221   :  { %v2957_v20 = vpop.f32.mrf.mxu3 }
 0x222   :  { %v2958_v37 = vadd.f32 %v2957_v20, %v2929_v8  ;;  %v2910_v16 = vadd.f32 %v2909_v9, %v2881_v54 }
 0x223   :  { %v2988_v53 = vpop.f32.mrf.mxu0  ;;  %v2938_v2 = vpop.f32.mrf.mxu2 }
 0x224   :  { %v5361_v39 = vadd.f32 %v2986_v48, %v2958_v37  ;;  %v2939_v23 = vadd.f32 %v2938_v2, %v2910_v16  ;;  %v4961_v16 = vld [vmem:[%s5494_s3] sm:$0xff] }
 0x225   :  { %v2911_v29 = vpop.f32.mrf.mxu1 }
 0x226   :  { %3013 = vrot.lane.b32.xlu1 %v5361_v39, %s5099_s26  ;;  %v2912_v17 = vadd.f32 %v2911_v29, %v2883_v0 }
 0x229   :  { %v2959_v44 = vpop.f32.mrf.mxu3 }
 0x22a   :  { %v2960_v58 = vadd.f32 %v2959_v44, %v2931_v5 }
 0x22b   :  { %v2991_v12 = vpop.f32.mrf.mxu0  ;;  %v2940_v28 = vpop.f32.mrf.mxu2 }
 0x22c   :  { %v5370_v13 = vadd.f32 %v2988_v53, %v2960_v58  ;;  %v2941_v32 = vadd.f32 %v2940_v28, %v2912_v17 }
 0x22e   :  { %3015 = vrot.lane.b32.xlu1 %v5370_v13, %s5099_s26 }
 0x231   :  { %v2962_v10 = vpop.f32.mrf.mxu3 }
 0x232   :  { %v2963_v35 = vadd.f32 %v2962_v10, %v2934_v55 }
 0x233   :  { %v2993_v47 = vpop.f32.mrf.mxu0 }
 0x234   :  { %v5379_v4 = vadd.f32 %v2991_v12, %v2963_v35  ;;  %v4988_v35 = vld [vmem:[%s5495_s4] ss:$0 sm:$0xff] }
 0x236   :  { %3017 = vrot.lane.b32.xlu2 %v5379_v4, %s5099_s26 }
 0x239   :  { %v2964_v31 = vpop.f32.mrf.mxu3 }
 0x23a   :  { %v2965_v26 = vadd.f32 %v2964_v31, %v2936_v63  ;;  %v4962_v63 = vld [vmem:[%s5494_s3 + $0x8] sm:$0xff] }
 0x23b   :  { %v2996_v48 = vpop.f32.mrf.mxu0  ;;  %3250 = vmatpush.bf16.msra.mxu2 %v4962_v63  ;;  %4975 = vmatpush.bf16.msrb.mxu3 %v4962_v63 }
 0x23c   :  { %v2994_v22 = vadd.f32 %v2993_v47, %v2965_v26 }
 0x23e   :  { %3019 = vrot.lane.b32.xlu2 %v2994_v22, %s5099_s26 }
 0x23f   :  { %3251 = vmatpush.bf16.msra.mxu2 %v4961_v16  ;;  %4976 = vmatpush.bf16.msrb.mxu3 %v4961_v16 }
 0x241   :  { %v2967_v49 = vpop.f32.mrf.mxu3 }
 0x242   :  { %v2968_v33 = vadd.f32 %v2967_v49, %v2939_v23 }
 0x243   :  { %v2998_v8 = vpop.f32.mrf.mxu0 }
 0x244   :  { %v2997_v19 = vadd.f32 %v2996_v48, %v2968_v33 }
 0x246   :  { %3021 = vrot.lane.b32.xlu0 %v2997_v19, %s5099_s26 }
 0x249   :  { %v2969_v45 = vpop.f32.mrf.mxu3 }
 0x24a   :  { %v2970_v21 = vadd.f32 %v2969_v45, %v2941_v32 }
 0x24c   :  { %v2999_v20 = vadd.f32 %v2998_v8, %v2970_v21 }
 0x24e   :  { %3023 = vrot.lane.b32.xlu1 %v2999_v20, %s5099_s26 }
 0x288   :  { %v3010_v37 = vpop.permute.xlu0 %3009 }
 0x289   :  { %v3033_v53 = vmax.f32 %v5349_v11, %v3010_v37 }
 0x28b   :  { %vm3041_vm0 = vcmp.gt.f32.partialorder %v3033_v53, 1.0 }
 0x28c   :  { %v4609_v15 = vsel %vm3041_vm0, 1.0, %v5105_v56 }
 0x290   :  { %v3012_v40 = vpop.permute.xlu0 %3011  ;;  %v3018_v5 = vpop.permute.xlu2 %3017 }
 0x291   :  { %v3034_v30 = vmax.f32 %v5354_v51, %v3012_v40  ;;  %v3037_v3 = vmax.f32 %v5379_v4, %v3018_v5 }
 0x293   :  { %vm3042_vm1 = vcmp.gt.f32.partialorder %v3034_v30, 1.0  ;;  %vm3045_vm6 = vcmp.gt.f32.partialorder %v3037_v3, 1.0 }
 0x294   :  { %v4610_v25 = vsel %vm3042_vm1, 1.0, %v5105_v56  ;;  %v4613_v36 = vsel %vm3045_vm6, 1.0, %v5105_v56 }
 0x295   :  { %v3065_v18 = vpack.c.bf16 %v4610_v25, %v4609_v15 }
 0x297   :  { %4633 = vmatmul.msk.bf16.vlgmr.msrb.gmra.mxu0 %vm3103_vm2, %v3065_v18 }
 0x298   :  { %v3014_v57 = vpop.permute.xlu1 %3013  ;;  %v3020_v41 = vpop.permute.xlu2 %3019 }
 0x299   :  { %v3035_v34 = vmax.f32 %v5361_v39, %v3014_v57  ;;  %v3038_v12 = vmax.f32 %v2994_v22, %v3020_v41 }
 0x29b   :  { %vm3043_vm3 = vcmp.gt.f32.partialorder %v3035_v34, 1.0  ;;  %vm3046_vm5 = vcmp.gt.f32.partialorder %v3038_v12, 1.0 }
 0x29c   :  { %v4611_v51 = vsel %vm3043_vm3, 1.0, %v5105_v56  ;;  %v4614_v39 = vsel %vm3046_vm5, 1.0, %v5105_v56  ;;  %vm3394_vm3 = vcmask 15360  }
 0x29d   :  { %v3067_v62 = vpack.c.bf16 %v4614_v39, %v4613_v36 }
 0x2a0   :  { %v3016_v44 = vpop.permute.xlu1 %3015 }
 0x2a1   :  { %v3036_v11 = vmax.f32 %v5370_v13, %v3016_v44 }
 0x2a3   :  { %vm3044_vm4 = vcmp.gt.f32.partialorder %v3036_v11, 1.0 }
 0x2a4   :  { %v4612_v58 = vsel %vm3044_vm4, 1.0, %v5105_v56 }
 0x2a5   :  { %v3066_v6 = vpack.c.bf16 %v4612_v58, %v4611_v51  ;;  %v4989_v51 = vld [vmem:[%s5495_s4 + $0x1] ss:$0 sm:$0xff]  ;;  %s5108_s4 = smov 127  }
 0x2a7   :  { %4634 = vmatmul.msk.bf16.vlgmr.msra.gmra.mxu1 %vm3103_vm2, %v3066_v6 }
 0x2b7   :  { %4635 = vmatmul.msk.bf16.gmra.mxu1 %vm3103_vm2, %v3067_v62 }
 0x2b8   :  { %v3022_v13 = vpop.permute.xlu0 %3021 }
 0x2b9   :  { %v3039_v42 = vmax.f32 %v2997_v19, %v3022_v13 }
 0x2bb   :  { %vm3047_vm7 = vcmp.gt.f32.partialorder %v3039_v42, 1.0 }
 0x2bc   :  { %v4615_v60 = vsel %vm3047_vm7, 1.0, %v5105_v56 }
 0x2c0   :  { %v3024_v38 = vpop.permute.xlu1 %3023 }
 0x2c1   :  { %v3040_v55 = vmax.f32 %v2999_v20, %v3024_v38 }
 0x2c3   :  { %vm3048_vm8 = vcmp.gt.f32.partialorder %v3040_v55, 1.0 }
 0x2c4   :  { %v4616_v7 = vsel %vm3048_vm8, 1.0, %v5105_v56 }
 0x2c5   :  { %v3068_v10 = vpack.c.bf16 %v4616_v7, %v4615_v60 }
 0x2c7   :  { %4636 = vmatmul.msk.bf16.gmra.mxu1 %vm3103_vm2, %v3068_v10  ;;  %vm3385_vm2 = vcmask 7168  }
 0x314   :  { %v3125_v59 = vpop.f32.mrf.mxu0 }
 0x315   :  { %v3126_v27 = vadd.f32 %v4988_v35, %v3125_v59 }
 0x317   :  { %3153 = vrot.lane.b32.xlu2 %v3126_v27, %s5106_s11 }
 0x31c   :  { %v3127_v4 = vpop.f32.mrf.mxu0 }
 0x31d   :  { %v3128_v24 = vadd.f32 %v4988_v35, %v3127_v4 }
 0x31f   :  { %3155 = vrot.lane.b32.xlu0 %v3128_v24, %s5106_s11 }
 0x324   :  { %v3130_v14 = vpop.f32.mrf.mxu1 }
 0x325   :  { %v3131_v43 = vadd.f32 %v4988_v35, %v3130_v14 }
 0x327   :  { %3157 = vrot.lane.b32.xlu1 %v3131_v43, %s5106_s11 }
 0x32c   :  { %v3132_v47 = vpop.f32.mrf.mxu1 }
 0x32d   :  { %v3133_v1 = vadd.f32 %v4988_v35, %v3132_v47 }
 0x32f   :  { %3159 = vrot.lane.b32.xlu2 %v3133_v1, %s5106_s11 }
 0x334   :  { %v3135_v9 = vpop.f32.mrf.mxu1 }
 0x335   :  { %v3136_v31 = vadd.f32 %v4988_v35, %v3135_v9 }
 0x337   :  { %3161 = vrot.lane.b32.xlu0 %v3136_v31, %s5106_s11 }
 0x33c   :  { %v3137_v26 = vpop.f32.mrf.mxu1 }
 0x33d   :  { %v3138_v2 = vadd.f32 %v4988_v35, %v3137_v26 }
 0x33f   :  { %3163 = vrot.lane.b32.xlu1 %v3138_v2, %s5106_s11 }
 0x344   :  { %v3140_v52 = vpop.f32.mrf.mxu1 }
 0x345   :  { %v3141_v54 = vadd.f32 %v4988_v35, %v3140_v52 }
 0x347   :  { %3165 = vrot.lane.b32.xlu2 %v3141_v54, %s5106_s11 }
 0x34c   :  { %v3142_v22 = vpop.f32.mrf.mxu1 }
 0x34d   :  { %v3143_v61 = vadd.f32 %v4988_v35, %v3142_v22 }
 0x34f   :  { %3167 = vrot.lane.b32.xlu0 %v3143_v61, %s5106_s11 }
 0x371   :  { %v3154_v50 = vpop.permute.xlu2 %3153 }
 0x372   :  { %v3177_v23 = vmax.f32 %v3126_v27, %v3154_v50 }
 0x374   :  { %vm3185_vm9 = vcmp.gt.f32.partialorder %v3177_v23, 1.0 }
 0x375   :  { %v4637_v33 = vsel %vm3185_vm9, 1.0, %v5105_v56 }
 0x389   :  { %v3160_v28 = vpop.permute.xlu2 %3159 }
 0x38a   :  { %v3180_v32 = vmax.f32 %v3133_v1, %v3160_v28 }
 0x38c   :  { %vm3188_vm13 = vcmp.gt.f32.partialorder %v3180_v32, 1.0 }
 0x38d   :  { %v4640_v21 = vsel %vm3188_vm13, 1.0, %v5105_v56 }
 0x391   :  { %v3156_v48 = vpop.permute.xlu0 %3155 }
 0x392   :  { %v3178_v49 = vmax.f32 %v3128_v24, %v3156_v48 }
 0x394   :  { %vm3186_vm10 = vcmp.gt.f32.partialorder %v3178_v49, 1.0 }
 0x395   :  { %v4638_v29 = vsel %vm3186_vm10, 1.0, %v5105_v56 }
 0x396   :  { %v3209_v0 = vpack.c.bf16 %v4638_v29, %v4637_v33 }
 0x398   :  { %4653 = vmatmul.msk.bf16.vlgmr.msra.gmra.mxu2 %vm3231_vm11, %v3209_v0 }
 0x399   :  { %v3158_v19 = vpop.permute.xlu1 %3157 }
 0x39a   :  { %v3179_v17 = vmax.f32 %v3131_v43, %v3158_v19 }
 0x39c   :  { %vm3187_vm12 = vcmp.gt.f32.partialorder %v3179_v17, 1.0 }
 0x39d   :  { %v4639_v45 = vsel %vm3187_vm12, 1.0, %v5105_v56 }
 0x39e   :  { %v3210_v8 = vpack.c.bf16 %v4640_v21, %v4639_v45 }
 0x3a1   :  { %v3166_v25 = vpop.permute.xlu2 %3165 }
 0x3a2   :  { %v3183_v18 = vmax.f32 %v3141_v54, %v3166_v25 }
 0x3a4   :  { %vm3191_vm0 = vcmp.gt.f32.partialorder %v3183_v18, 1.0 }
 0x3a5   :  { %v4643_v5 = vsel %vm3191_vm0, 1.0, %v5105_v56 }
 0x3a8   :  { %4654 = vmatmul.msk.bf16.gmra.mxu2 %vm3231_vm11, %v3210_v8 }
 0x3a9   :  { %v3162_v20 = vpop.permute.xlu0 %3161 }
 0x3aa   :  { %v3181_v46 = vmax.f32 %v3136_v31, %v3162_v20 }
 0x3ac   :  { %vm3189_vm14 = vcmp.gt.f32.partialorder %v3181_v46, 1.0 }
 0x3ad   :  { %v4641_v40 = vsel %vm3189_vm14, 1.0, %v5105_v56 }
 0x3b1   :  { %v3164_v37 = vpop.permute.xlu1 %3163 }
 0x3b2   :  { %v3182_v53 = vmax.f32 %v3138_v2, %v3164_v37 }
 0x3b4   :  { %vm3190_vm15 = vcmp.gt.f32.partialorder %v3182_v53, 1.0 }
 0x3b5   :  { %v4642_v30 = vsel %vm3190_vm15, 1.0, %v5105_v56 }
 0x3b6   :  { %v3211_v15 = vpack.c.bf16 %v4642_v30, %v4641_v40 }
 0x3b8   :  { %4655 = vmatmul.msk.bf16.gmra.mxu2 %vm3231_vm11, %v3211_v15 }
 0x3c1   :  { %v3168_v57 = vpop.permute.xlu0 %3167 }
 0x3c2   :  { %v3184_v34 = vmax.f32 %v3143_v61, %v3168_v57 }
 0x3c4   :  { %vm3192_vm1 = vcmp.gt.f32.partialorder %v3184_v34, 1.0 }
 0x3c5   :  { %v4644_v44 = vsel %vm3192_vm1, 1.0, %v5105_v56 }
 0x3c6   :  { %v3212_v11 = vpack.c.bf16 %v4644_v44, %v4643_v5 }
 0x3c8   :  { %4656 = vmatmul.msk.bf16.vlgmr.msrb.gmra.mxu3 %vm3231_vm11, %v3212_v11 }
 0x41b   :  { %v3253_v58 = vpop.f32.mrf.mxu2 }
 0x41c   :  { %v3254_v6 = vadd.f32 %v4989_v51, %v3253_v58 }
 0x41e   :  { %3281 = vrot.lane.b32.xlu1 %v3254_v6, %s5107_s17 }
 0x423   :  { %v3255_v41 = vpop.f32.mrf.mxu2 }
 0x424   :  { %v3256_v12 = vadd.f32 %v4989_v51, %v3255_v41 }
 0x426   :  { %3283 = vrot.lane.b32.xlu2 %v3256_v12, %s5107_s17 }
 0x42b   :  { %v3258_v3 = vpop.f32.mrf.mxu2 }
 0x42c   :  { %v3259_v39 = vadd.f32 %v4989_v51, %v3258_v3 }
 0x42e   :  { %3285 = vrot.lane.b32.xlu0 %v3259_v39, %s5107_s17 }
 0x433   :  { %v3260_v36 = vpop.f32.mrf.mxu2 }
 0x434   :  { %v3261_v62 = vadd.f32 %v4989_v51, %v3260_v36 }
 0x436   :  { %3287 = vrot.lane.b32.xlu1 %v3261_v62, %s5107_s17 }
 0x43b   :  { %v3263_v56 = vpop.f32.mrf.mxu2 }
 0x43c   :  { %v3264_v13 = vadd.f32 %v4989_v51, %v3263_v56 }
 0x43e   :  { %3289 = vrot.lane.b32.xlu2 %v3264_v13, %s5107_s17 }
 0x443   :  { %v3265_v42 = vpop.f32.mrf.mxu2 }
 0x444   :  { %v3266_v38 = vadd.f32 %v4989_v51, %v3265_v42 }
 0x446   :  { %3291 = vrot.lane.b32.xlu0 %v3266_v38, %s5107_s17 }
 0x44b   :  { %v3268_v55 = vpop.f32.mrf.mxu3 }
 0x44c   :  { %v5435_v60 = vadd.f32 %v4989_v51, %v3268_v55 }
 0x44e   :  { %3293 = vrot.lane.b32.xlu1 %v5435_v60, %s5107_s17 }
 0x453   :  { %v3270_v7 = vpop.f32.mrf.mxu3 }
 0x454   :  { %v3271_v10 = vadd.f32 %v4989_v51, %v3270_v7 }
 0x456   :  { %3295 = vrot.lane.b32.xlu2 %v3271_v10, %s5107_s17 }
 0x480   :  { %v3284_v35 = vpop.permute.xlu2 %3283 }
 0x481   :  { %v3306_v59 = vsub.f32 %v3256_v12, %v3284_v35 }
 0x483   :  { %v3315_v27 = vmul.f32 1.442695, %v3306_v59 }
 0x485   :  { %4990 = vpow2.f32 %v3315_v27 }
 0x48b   :  { %v4991_v4 = vpop.eup %4990 }
 0x48c   :  { %v3330_v24 = vadd.f32 1.0, %v4991_v4 }
 0x48e   :  { %4992 = vrcp.f32 %v3330_v24 }
 0x490   :  { %v3282_v14 = vpop.permute.xlu1 %3281 }
 0x491   :  { %v3305_v43 = vsub.f32 %v3254_v6, %v3282_v14 }
 0x493   :  { %v3313_v47 = vmul.f32 1.442695, %v3305_v43 }
 0x494   :  { %v5438_v1 = vpop.eup %4992 }
 0x495   :  { %4994 = vpow2.f32 %v3313_v47  ;;  %3363 = vrot.lane.b32.xlu1 %v5438_v1, %s5108_s4  ;;  %v3346_v58 = vsub.f32 1.0, %v5438_v1 }
 0x498   :  { %v3290_v63 = vpop.permute.xlu2 %3289 }
 0x499   :  { %v3309_v9 = vsub.f32 %v3264_v13, %v3290_v63 }
 0x49b   :  { %v4995_v31 = vpop.eup %4994  ;;  %v3321_v26 = vmul.f32 1.442695, %v3309_v9 }
 0x49c   :  { %v3329_v2 = vadd.f32 1.0, %v4995_v31 }
 0x49d   :  { %4996 = vpow2.f32 %v3321_v26 }
 0x49e   :  { %4998 = vrcp.f32 %v3329_v2 }
 0x4a0   :  { %v3286_v52 = vpop.permute.xlu0 %3285 }
 0x4a1   :  { %v3307_v54 = vsub.f32 %v3259_v39, %v3286_v52 }
 0x4a3   :  { %v4997_v22 = vpop.eup %4996  ;;  %v3317_v61 = vmul.f32 1.442695, %v3307_v54 }
 0x4a4   :  { %v4999_v16 = vpop.eup %4998  ;;  %v3333_v50 = vadd.f32 1.0, %v4997_v22 }
 0x4a5   :  { %5000 = vpow2.f32 %v3317_v61  ;;  %3361 = vrot.lane.b32.xlu0 %v4999_v16, %s5108_s4  ;;  %v3345_v36 = vsub.f32 1.0, %v4999_v16 }
 0x4a6   :  { %5002 = vrcp.f32 %v3333_v50 }
 0x4a8   :  { %v3288_v23 = vpop.permute.xlu1 %3287 }
 0x4a9   :  { %v3308_v48 = vsub.f32 %v3261_v62, %v3288_v23 }
 0x4ab   :  { %v5001_v49 = vpop.eup %5000  ;;  %v3319_v33 = vmul.f32 1.442695, %v3308_v48 }
 0x4ac   :  { %v5003_v29 = vpop.eup %5002  ;;  %v3331_v0 = vadd.f32 1.0, %v5001_v49 }
 0x4ad   :  { %5004 = vpow2.f32 %v3319_v33  ;;  %3369 = vrot.lane.b32.xlu1 %v5003_v29, %s5108_s4  ;;  %v3349_v13 = vsub.f32 1.0, %v5003_v29 }
 0x4ae   :  { %5006 = vrcp.f32 %v3331_v0 }
 0x4b0   :  { %v3296_v19 = vpop.permute.xlu2 %3295 }
 0x4b1   :  { %v3312_v28 = vsub.f32 %v3271_v10, %v3296_v19 }
 0x4b3   :  { %v5005_v17 = vpop.eup %5004  ;;  %v3327_v32 = vmul.f32 1.442695, %v3312_v28 }
 0x4b4   :  { %v5007_v45 = vpop.eup %5006  ;;  %v3332_v21 = vadd.f32 1.0, %v5005_v17 }
 0x4b5   :  { %5008 = vpow2.f32 %v3327_v32  ;;  %3365 = vrot.lane.b32.xlu2 %v5007_v45, %s5108_s4  ;;  %v3347_v12 = vsub.f32 1.0, %v5007_v45 }
 0x4b6   :  { %5010 = vrcp.f32 %v3332_v21 }
 0x4b8   :  { %v3292_v8 = vpop.permute.xlu0 %3291 }
 0x4b9   :  { %v3310_v20 = vsub.f32 %v3266_v38, %v3292_v8 }
 0x4bb   :  { %v5009_v46 = vpop.eup %5008  ;;  %v3323_v37 = vmul.f32 1.442695, %v3310_v20 }
 0x4bc   :  { %v5011_v53 = vpop.eup %5010  ;;  %v3336_v40 = vadd.f32 1.0, %v5009_v46 }
 0x4bd   :  { %5012 = vpow2.f32 %v3323_v37  ;;  %3367 = vrot.lane.b32.xlu0 %v5011_v53, %s5108_s4  ;;  %v3348_v10 = vsub.f32 1.0, %v5011_v53 }
 0x4be   :  { %5014 = vrcp.f32 %v3336_v40 }
 0x4c0   :  { %v3294_v30 = vpop.permute.xlu1 %3293 }
 0x4c1   :  { %v3311_v15 = vsub.f32 %v5435_v60, %v3294_v30 }
 0x4c3   :  { %v5013_v25 = vpop.eup %5012  ;;  %v3325_v18 = vmul.f32 1.442695, %v3311_v15 }
 0x4c4   :  { %v5015_v57 = vpop.eup %5014  ;;  %v3334_v34 = vadd.f32 1.0, %v5013_v25 }
 0x4c5   :  { %5016 = vpow2.f32 %v3325_v18  ;;  %3375 = vrot.lane.b32.xlu1 %v5015_v57, %s5108_s4  ;;  %v3352_v27 = vsub.f32 1.0, %v5015_v57 }
 0x4c6   :  { %5018 = vrcp.f32 %v3334_v34 }
 0x4cb   :  { %v5017_v5 = vpop.eup %5016 }
 0x4cc   :  { %v5019_v44 = vpop.eup %5018  ;;  %v3335_v11 = vadd.f32 1.0, %v5017_v5 }
 0x4cd   :  { %3371 = vrot.lane.b32.xlu2 %v5019_v44, %s5108_s4  ;;  %v3350_v55 = vsub.f32 1.0, %v5019_v44 }
 0x4ce   :  { %5020 = vrcp.f32 %v3335_v11 }
 0x4d4   :  { %v5021_v51 = vpop.eup %5020 }
 0x4d5   :  { %3373 = vrot.lane.b32.xlu0 %v5021_v51, %s5108_s4  ;;  %v3351_v14 = vsub.f32 1.0, %v5021_v51 }
 0x507   :  { %v3364_v6 = vpop.permute.xlu1 %3363 }
 0x508   :  { %v3387_v41 = vsel %vm3385_vm2, %v3364_v6, %v3346_v58 }
 0x509   :  { %3396 = vst.msk [vmem:[%s5496_s5 + $0x8] sm:$0xff] %vm3394_vm3, %v3387_v41 }
 0x50f   :  { %v3366_v3 = vpop.permute.xlu2 %3365 }
 0x510   :  { %v3388_v39 = vsel %vm3385_vm2, %v3366_v3, %v3347_v12 }
 0x511   :  { %3397 = vst.msk [vmem:[%s5496_s5 + $0x10] sm:$0xff] %vm3394_vm3, %v3388_v39 }
 0x517   :  { %v3362_v62 = vpop.permute.xlu0 %3361 }
 0x518   :  { %v3386_v56 = vsel %vm3385_vm2, %v3362_v62, %v3345_v36 }
 0x519   :  { %3395 = vst.msk [vmem:[%s5496_s5] sm:$0xff] %vm3394_vm3, %v3386_v56 }
 0x51f   :  { %v3370_v42 = vpop.permute.xlu1 %3369 }
 0x520   :  { %v3390_v38 = vsel %vm3385_vm2, %v3370_v42, %v3349_v13 }
 0x521   :  { %3399 = vst.msk [vmem:[%s5496_s5 + $0x20] sm:$0xff] %vm3394_vm3, %v3390_v38 }
 0x527   :  { %v3372_v60 = vpop.permute.xlu2 %3371 }
 0x528   :  { %v3391_v7 = vsel %vm3385_vm2, %v3372_v60, %v3350_v55 }
 0x529   :  { %3400 = vst.msk [vmem:[%s5496_s5 + $0x28] sm:$0xff] %vm3394_vm3, %v3391_v7 }
 0x52f   :  { %v3368_v35 = vpop.permute.xlu0 %3367 }
 0x530   :  { %v3389_v59 = vsel %vm3385_vm2, %v3368_v35, %v3348_v10 }
 0x531   :  { %3398 = vst.msk [vmem:[%s5496_s5 + $0x18] sm:$0xff] %vm3394_vm3, %v3389_v59 }
 0x537   :  { %v3376_v4 = vpop.permute.xlu1 %3375 }
 0x538   :  { %v3393_v24 = vsel %vm3385_vm2, %v3376_v4, %v3352_v27 }
 0x539   :  { %3402 = vst.msk [vmem:[%s5496_s5 + $0x38] sm:$0xff] %vm3394_vm3, %v3393_v24 }
 0x547   :  { %v3374_v43 = vpop.permute.xlu0 %3373 }
 0x548   :  { %v3392_v47 = vsel %vm3385_vm2, %v3374_v43, %v3351_v14 }
 0x549   :  { %3401 = vst.msk [vmem:[%s5496_s5 + $0x30] sm:$0xff] %vm3394_vm3, %v3392_v47 }
 0x54a   :  { %3407 = vsyncpa [#allocation3], 1 }
 0x54b   :  { %3408 = vsyncpa [#allocation5], 1 }

</bundles_post_ra>
